<compile_context>
chip_gen: v6e
topology: v6e:2x2x1
jax: 0.10.0
libtpu: 0.0.40
codegen_flags: <defaults>
</compile_context>

<pallas_src>
import math
import functools

import jax
import jax.numpy as jnp
from jax.experimental import pallas as pl
from jax.experimental.pallas import tpu as pltpu


# ----------------------------- configuration ---------------------------------

def _device_kind():
    try:
        return jax.devices()[0].device_kind.lower()
    except Exception:
        return ""


_IS_V7 = "v7" in _device_kind()

# Tile caps. v5e/v6e have 128 MiB physical VMEM -> bigger tiles amortize the ~0.35us
# per-grid-step overhead; v7x has 64 MiB -> keep the previous moderate caps.
_TM, _TN, _TK = (256, 256, 512) if _IS_V7 else (512, 512, 1024)
_TK_LN = 256 if _IS_V7 else 512          # contraction tile for the matmul+LN kernel
_TM_FFN, _TF_FFN = 256, 256              # fused-FFN row / d_ff tiles (full-D blocks)
_VMEM_LIMIT = 48 * 1024 * 1024           # explicit scoped-VMEM limit for heavy kernels

# Flip to jnp.bfloat16 to use the MXU's native bf16 path (~2-4x on projections/FFN);
# keep float32 to match the PyTorch module (and the 5e-3 self-check below).
MATMUL_DTYPE = jnp.float32


def _pick_tile(dim, cap, align):
    """Largest tile <= cap that is `align`-aligned and divides `dim`; else the full dim."""
    if dim <= cap:
        return dim
    t = (cap // align) * align
    while t >= align:
        if dim % t == 0:
            return t
        t -= align
    return dim


def _mm(a, b):
    """MXU matmul with optional bf16 operand cast, always f32 accumulation."""
    return jnp.dot(a.astype(MATMUL_DTYPE), b.astype(MATMUL_DTYPE),
                   preferred_element_type=jnp.float32)


# ----------------------------- Pallas kernels --------------------------------
# NOTE: constant-index operands (weights / biases / LN params) would ideally be marked
# pipeline_mode=pl.Buffered(1) to avoid wasting VMEM on double-buffering; omitted here
# for API-version safety and compensated by the explicit vmem_limit_bytes.

def _linear_kernel(x_ref, w_ref, b_ref, o_ref, acc_ref, *, relu):
    """o = [relu](x @ w + b), accumulated over the K grid axis (axis 2)."""
    prod = _mm(x_ref[...], w_ref[...])
    k = pl.program_id(2)

    @pl.when(k == 0)
    def _first():
        acc_ref[...] = prod          # direct write: no zeros + read-modify-write

    @pl.when(k > 0)
    def _accum():
        acc_ref[...] += prod

    @pl.when(k == pl.num_programs(2) - 1)
    def _done():
        out = acc_ref[...] + b_ref[...].astype(jnp.float32)
        if relu:
            out = jnp.maximum(out, 0.0)
        o_ref[...] = out.astype(o_ref.dtype)


def linear(x, W, b, relu=False):
    """y = x @ W + b (optionally fused ReLU).  x: (..., K), W: (K, N), b: (N,)."""
    lead = x.shape[:-1]
    K = x.shape[-1]
    N = W.shape[1]
    M = int(math.prod(lead)) if lead else 1
    x2 = x.reshape(M, K)

    tm = _pick_tile(M, _TM, 8)
    tn = _pick_tile(N, _TN, 128)
    tk = _pick_tile(K, _TK, 128)
    grid = (M // tm, N // tn, K // tk)

    out = pl.pallas_call(
        functools.partial(_linear_kernel, relu=relu),
        out_shape=jax.ShapeDtypeStruct((M, N), x.dtype),
        grid=grid,
        in_specs=[
            pl.BlockSpec((tm, tk), lambda i, j, k: (i, k)),
            pl.BlockSpec((tk, tn), lambda i, j, k: (k, j)),
            pl.BlockSpec((1, tn), lambda i, j, k: (0, j)),
        ],
        out_specs=pl.BlockSpec((tm, tn), lambda i, j, k: (i, j)),
        scratch_shapes=[pltpu.VMEM((tm, tn), jnp.float32)],
        compiler_params=pltpu.CompilerParams(
            dimension_semantics=("parallel", "parallel", "arbitrary"),
            vmem_limit_bytes=_VMEM_LIMIT),
    )(x2, W, b.reshape(1, N))
    return out.reshape(*lead, N)


def _linear_add_ln_kernel(x_ref, w_ref, b_ref, res_ref, g_ref, be_ref,
                          o_ref, acc_ref, *, eps):
    """o = LayerNorm(res + x @ w + b); K reduction on grid axis 1, full N resident."""
    prod = _mm(x_ref[...], w_ref[...])
    k = pl.program_id(1)

    @pl.when(k == 0)
    def _first():
        acc_ref[...] = prod

    @pl.when(k > 0)
    def _accum():
        acc_ref[...] += prod

    @pl.when(k == pl.num_programs(1) - 1)
    def _done():
        z = (acc_ref[...] + b_ref[...].astype(jnp.float32)
             + res_ref[...].astype(jnp.float32))
        mean = jnp.mean(z, axis=-1, keepdims=True)
        var = jnp.mean(jnp.square(z - mean), axis=-1, keepdims=True)
        zn = (z - mean) * jax.lax.rsqrt(var + eps)
        o_ref[...] = (zn * g_ref[...].astype(jnp.float32)
                      + be_ref[...].astype(jnp.float32)).astype(o_ref.dtype)


def linear_add_layernorm(x, W, b, res, gamma, beta, eps=1e-5):
    """LayerNorm(res + x @ W + b) fused in one kernel (PyTorch LayerNorm, eps=1e-5)."""
    # TODO(synk): for d_model >= ~8K, tile N and use a two-pass LayerNorm instead of
    # keeping the full-N accumulator / residual resident per row tile.
    lead = x.shape[:-1]
    K = x.shape[-1]
    N = W.shape[1]
    M = int(math.prod(lead)) if lead else 1
    x2 = x.reshape(M, K)
    r2 = res.reshape(M, N)

    tm = _pick_tile(M, _TM, 8)
    tk = _pick_tile(K, _TK_LN, 128)
    grid = (M // tm, K // tk)

    out = pl.pallas_call(
        functools.partial(_linear_add_ln_kernel, eps=eps),
        out_shape=jax.ShapeDtypeStruct((M, N), x.dtype),
        grid=grid,
        in_specs=[
            pl.BlockSpec((tm, tk), lambda i, k: (i, k)),
            pl.BlockSpec((tk, N), lambda i, k: (k, 0)),
            pl.BlockSpec((1, N), lambda i, k: (0, 0)),
            pl.BlockSpec((tm, N), lambda i, k: (i, 0)),
            pl.BlockSpec((1, N), lambda i, k: (0, 0)),
            pl.BlockSpec((1, N), lambda i, k: (0, 0)),
        ],
        out_specs=pl.BlockSpec((tm, N), lambda i, k: (i, 0)),
        scratch_shapes=[pltpu.VMEM((tm, N), jnp.float32)],
        compiler_params=pltpu.CompilerParams(
            dimension_semantics=("parallel", "arbitrary"),
            vmem_limit_bytes=_VMEM_LIMIT),
    )(x2, W, b.reshape(1, N), r2, gamma.reshape(1, N), beta.reshape(1, N))
    return out.reshape(*lead, N)


def _ffn_add_ln_kernel(x_ref, w1_ref, b1_ref, w2_ref, b2_ref, g_ref, be_ref,
                       o_ref, acc_ref, *, eps):
    """o = LayerNorm(x + relu(x @ w1 + b1) @ w2 + b2), tiled over d_ff (grid axis 1).

    The (tm, tf) ReLU intermediate never leaves VMEM; the second matmul is accumulated
    into an f32 (tm, D) scratch across d_ff tiles."""
    f = pl.program_id(1)
    x = x_ref[...]
    h = _mm(x, w1_ref[...]) + b1_ref[...].astype(jnp.float32)
    h = jnp.maximum(h, 0.0)
    part = _mm(h, w2_ref[...])

    @pl.when(f == 0)
    def _first():
        acc_ref[...] = part

    @pl.when(f > 0)
    def _accum():
        acc_ref[...] += part

    @pl.when(f == pl.num_programs(1) - 1)
    def _done():
        z = acc_ref[...] + b2_ref[...].astype(jnp.float32) + x.astype(jnp.float32)
        mean = jnp.mean(z, axis=-1, keepdims=True)
        var = jnp.mean(jnp.square(z - mean), axis=-1, keepdims=True)
        zn = (z - mean) * jax.lax.rsqrt(var + eps)
        o_ref[...] = (zn * g_ref[...].astype(jnp.float32)
                      + be_ref[...].astype(jnp.float32)).astype(o_ref.dtype)


def feed_forward_add_layernorm(p, x, gamma, beta, eps=1e-5):
    """LayerNorm(x + FFN(x)) fused in one kernel, tiled over rows and d_ff."""
    w1, b1 = p["lin1"]["w"], p["lin1"]["b"]
    w2, b2 = p["lin2"]["w"], p["lin2"]["b"]

    lead = x.shape[:-1]
    D = x.shape[-1]
    F = w1.shape[1]
    M = int(math.prod(lead)) if lead else 1
    x2 = x.reshape(M, D)

    tm = _pick_tile(M, _TM_FFN, 8)
    tf = _pick_tile(F, _TF_FFN, 128)
    grid = (M // tm, F // tf)

    out = pl.pallas_call(
        functools.partial(_ffn_add_ln_kernel, eps=eps),
        out_shape=jax.ShapeDtypeStruct((M, D), x.dtype),
        grid=grid,
        in_specs=[
            pl.BlockSpec((tm, D), lambda i, f: (i, 0)),
            pl.BlockSpec((D, tf), lambda i, f: (0, f)),
            pl.BlockSpec((1, tf), lambda i, f: (0, f)),
            pl.BlockSpec((tf, D), lambda i, f: (f, 0)),
            pl.BlockSpec((1, D), lambda i, f: (0, 0)),
            pl.BlockSpec((1, D), lambda i, f: (0, 0)),
            pl.BlockSpec((1, D), lambda i, f: (0, 0)),
        ],
        out_specs=pl.BlockSpec((tm, D), lambda i, f: (i, 0)),
        scratch_shapes=[pltpu.VMEM((tm, D), jnp.float32)],
        compiler_params=pltpu.CompilerParams(
            dimension_semantics=("parallel", "arbitrary"),
            vmem_limit_bytes=_VMEM_LIMIT),
    )(x2, w1, b1.reshape(1, F), w2, b2.reshape(1, D),
      gamma.reshape(1, D), beta.reshape(1, D))
    return out.reshape(*lead, D)


def _attn_heads(q_ref, kv_ref, o_ref, *, num_heads, scale, q_col0, kv_col0):
    """Per-head attention from packed projections; head-merged (n, d) store.

    q_ref holds q columns starting at q_col0; kv_ref holds [K | V] columns starting at
    kv_col0 (K occupies d columns, V the next d columns)."""
    d = o_ref.shape[-1]
    dk = d // num_heads
    outs = []
    for h in range(num_heads):
        q = q_ref[0, :, q_col0 + h * dk: q_col0 + (h + 1) * dk].astype(jnp.float32) * scale
        k = kv_ref[0, :, kv_col0 + h * dk: kv_col0 + (h + 1) * dk].astype(jnp.float32)
        v = kv_ref[0, :, kv_col0 + d + h * dk: kv_col0 + d + (h + 1) * dk].astype(jnp.float32)
        # Contract on the feature axis directly — no k.T transpose through the XLU.
        s = jax.lax.dot_general(q, k, (((1,), (1,)), ((), ())),
                                preferred_element_type=jnp.float32)   # (nq, nk)
        m = jnp.max(s, axis=-1, keepdims=True)
        p = jnp.exp(s - m)
        p = p * pl.reciprocal(jnp.sum(p, axis=-1, keepdims=True), approx=True)
        outs.append(jnp.dot(p, v, preferred_element_type=jnp.float32))
    o_ref[0] = jnp.concatenate(outs, axis=-1).astype(o_ref.dtype)
    # TODO(synk): for long sequences / many heads, tile the grid per (batch, head) with an
    # online-softmax (flash) loop over key blocks instead of holding full (nq, nk) scores;
    # requires dk % 128 == 0 for lane-aligned head slicing via BlockSpec.


def _attn_self_kernel(qkv_ref, o_ref, *, num_heads, scale):
    d = o_ref.shape[-1]
    _attn_heads(qkv_ref, qkv_ref, o_ref, num_heads=num_heads, scale=scale,
                q_col0=0, kv_col0=d)


def _attn_cross_kernel(q_ref, kv_ref, o_ref, *, num_heads, scale):
    _attn_heads(q_ref, kv_ref, o_ref, num_heads=num_heads, scale=scale,
                q_col0=0, kv_col0=0)


def attention_self(qkv, num_heads):
    """qkv: (B, n, 3d) fused projections; returns head-merged (B, n, d)."""
    B, n, d3 = qkv.shape
    d = d3 // 3
    scale = 1.0 / math.sqrt(d // num_heads)
    return pl.pallas_call(
        functools.partial(_attn_self_kernel, num_heads=num_heads, scale=scale),
        out_shape=jax.ShapeDtypeStruct((B, n, d), qkv.dtype),
        grid=(B,),
        in_specs=[pl.BlockSpec((1, n, d3), lambda b: (b, 0, 0))],
        out_specs=pl.BlockSpec((1, n, d), lambda b: (b, 0, 0)),
        compiler_params=pltpu.CompilerParams(dimension_semantics=("parallel",)),
    )(qkv)


def attention_cross(q, kv, num_heads):
    """q: (B, nq, d), kv: (B, nk, 2d) fused K/V projections; returns (B, nq, d)."""
    B, nq, d = q.shape
    nk = kv.shape[1]
    scale = 1.0 / math.sqrt(d // num_heads)
    return pl.pallas_call(
        functools.partial(_attn_cross_kernel, num_heads=num_heads, scale=scale),
        out_shape=jax.ShapeDtypeStruct((B, nq, d), q.dtype),
        grid=(B,),
        in_specs=[
            pl.BlockSpec((1, nq, d), lambda b: (b, 0, 0)),
            pl.BlockSpec((1, nk, 2 * d), lambda b: (b, 0, 0)),
        ],
        out_specs=pl.BlockSpec((1, nq, d), lambda b: (b, 0, 0)),
        compiler_params=pltpu.CompilerParams(dimension_semantics=("parallel",)),
    )(q, kv)


# ----------------------------- Model (composition) ---------------------------

def mha_self_block(p, x, num_heads, ln_g, ln_b):
    """x -> LayerNorm(x + SelfAttention(x)); single fused QKV matmul, no XLA transposes."""
    qkv = linear(x, p["w_qkv"], p["b_qkv"])                        # (B, n, 3d)
    o = attention_self(qkv, num_heads)                             # (B, n, d)
    return linear_add_layernorm(o, p["wo"]["w"], p["wo"]["b"], x, ln_g, ln_b)


def mha_cross_block(p, x, mem, num_heads, ln_g, ln_b):
    """x -> LayerNorm(x + CrossAttention(x, mem)); fused K/V matmul, no XLA transposes."""
    q = linear(x, p["wq"]["w"], p["wq"]["b"])                      # (B, nq, d)
    kv = linear(mem, p["w_kv"], p["b_kv"])                         # (B, nk, 2d)
    o = attention_cross(q, kv, num_heads)                          # (B, nq, d)
    return linear_add_layernorm(o, p["wo"]["w"], p["wo"]["b"], x, ln_g, ln_b)


def encoder_layer(p, x, num_heads):
    x = mha_self_block(p["attn"], x, num_heads, p["ln1"]["g"], p["ln1"]["b"])
    x = feed_forward_add_layernorm(p["ffn"], x, p["ln2"]["g"], p["ln2"]["b"])
    return x


def decoder_layer(p, x, enc_out, num_heads):
    x = mha_self_block(p["attn1"], x, num_heads, p["ln1"]["g"], p["ln1"]["b"])
    x = mha_cross_block(p["attn2"], x, enc_out, num_heads, p["ln2"]["g"], p["ln2"]["b"])
    x = feed_forward_add_layernorm(p["ffn"], x, p["ln3"]["g"], p["ln3"]["b"])
    return x


def positional_encoding_table(d_model, max_len=512):
    pos = jnp.arange(max_len, dtype=jnp.float32)[:, None]
    div = jnp.exp(jnp.arange(0, d_model, 2, dtype=jnp.float32)
                  * -(math.log(10000.0) / d_model))
    pe = jnp.zeros((max_len, d_model), jnp.float32)
    pe = pe.at[:, 0::2].set(jnp.sin(pos * div))
    pe = pe.at[:, 1::2].set(jnp.cos(pos * div))
    return pe


def transformer_forward(params, src, trg, num_heads):
    pe = params["pe"]
    src = src + pe[None, :src.shape[1], :]
    trg = trg + pe[None, :trg.shape[1], :]
    for lp in params["enc"]:
        src = encoder_layer(lp, src, num_heads)
    for lp in params["dec"]:
        trg = decoder_layer(lp, trg, src, num_heads)
    return linear(trg, params["fc"]["w"], params["fc"]["b"])


# ----------------------------- Parameter init --------------------------------

def init_linear_params(key, d_in, d_out):
    k1, k2 = jax.random.split(key)
    bound = 1.0 / math.sqrt(d_in)
    return {"w": jax.random.uniform(k1, (d_in, d_out), jnp.float32, -bound, bound),
            "b": jax.random.uniform(k2, (d_out,), jnp.float32, -bound, bound)}


def init_mha_params(key, d_model):
    ks = jax.random.split(key, 4)
    p = {name: init_linear_params(k, d_model, d_model)
         for name, k in zip(["wq", "wk", "wv", "wo"], ks)}
    # Pre-fused projection weights (hoisted out of the forward pass — review item 1).
    p["w_qkv"] = jnp.concatenate([p["wq"]["w"], p["wk"]["w"], p["wv"]["w"]], axis=1)
    p["b_qkv"] = jnp.concatenate([p["wq"]["b"], p["wk"]["b"], p["wv"]["b"]], axis=0)
    p["w_kv"] = jnp.concatenate([p["wk"]["w"], p["wv"]["w"]], axis=1)
    p["b_kv"] = jnp.concatenate([p["wk"]["b"], p["wv"]["b"]], axis=0)
    return p


def init_ffn_params(key, d_model, d_ff):
    k1, k2 = jax.random.split(key)
    return {"lin1": init_linear_params(k1, d_model, d_ff),
            "lin2": init_linear_params(k2, d_ff, d_model)}


def init_ln_params(d_model):
    return {"g": jnp.ones((d_model,), jnp.float32),
            "b": jnp.zeros((d_model,), jnp.float32)}


def init_transformer_params(key, num_enc, num_dec, d_model, d_ff, max_len=512):
    keys = jax.random.split(key, num_enc + num_dec + 1)
    enc = []
    for i in range(num_enc):
        ka, kf = jax.random.split(keys[i])
        enc.append({"attn": init_mha_params(ka, d_model),
                    "ffn": init_ffn_params(kf, d_model, d_ff),
                    "ln1": init_ln_params(d_model),
                    "ln2": init_ln_params(d_model)})
    dec = []
    for i in range(num_dec):
        ka1, ka2, kf = jax.random.split(keys[num_enc + i], 3)
        dec.append({"attn1": init_mha_params(ka1, d_model),
                    "attn2": init_mha_params(ka2, d_model),
                    "ffn": init_ffn_params(kf, d_model, d_ff),
                    "ln1": init_ln_params(d_model),
                    "ln2": init_ln_params(d_model),
                    "ln3": init_ln_params(d_model)})
    fc = init_linear_params(keys[-1], d_model, d_model)
    return {"enc": enc, "dec": dec, "fc": fc,
            "pe": positional_encoding_table(d_model, max_len)}


# ----------------------------- Pure-JAX reference ----------------------------

def _ref_linear(x, W, b, relu=False):
    y = x @ W + b
    return jnp.maximum(y, 0.0) if relu else y


def _ref_mha(p, Q, K, V, num_heads):
    B, n, d = Q.shape
    dk = d // num_heads
    q = _ref_linear(Q, p["wq"]["w"], p["wq"]["b"]).reshape(B, n, num_heads, dk).transpose(0, 2, 1, 3)
    k = _ref_linear(K, p["wk"]["w"], p["wk"]["b"]).reshape(B, K.shape[1], num_heads, dk).transpose(0, 2, 1, 3)
    v = _ref_linear(V, p["wv"]["w"], p["wv"]["b"]).reshape(B, V.shape[1], num_heads, dk).transpose(0, 2, 1, 3)
    s = jnp.einsum("bhqd,bhkd->bhqk", q, k) / math.sqrt(dk)
    w = jax.nn.softmax(s, axis=-1)
    o = jnp.einsum("bhqk,bhkd->bhqd", w, v).transpose(0, 2, 1, 3).reshape(B, n, d)
    return _ref_linear(o, p["wo"]["w"], p["wo"]["b"])


def _ref_add_ln(x, y, g, b, eps=1e-5):
    z = x + y
    mean = jnp.mean(z, axis=-1, keepdims=True)
    var = jnp.mean(jnp.square(z - mean), axis=-1, keepdims=True)
    return (z - mean) * jax.lax.rsqrt(var + eps) * g + b


def _ref_transformer(params, src, trg, num_heads):
    pe = params["pe"]
    src = src + pe[None, :src.shape[1], :]
    trg = trg + pe[None, :trg.shape[1], :]
    for lp in params["enc"]:
        a = _ref_mha(lp["attn"], src, src, src, num_heads)
        src = _ref_add_ln(src, a, lp["ln1"]["g"], lp["ln1"]["b"])
        f = _ref_linear(_ref_linear(src, lp["ffn"]["lin1"]["w"], lp["ffn"]["lin1"]["b"], relu=True),
                        lp["ffn"]["lin2"]["w"], lp["ffn"]["lin2"]["b"])
        src = _ref_add_ln(src, f, lp["ln2"]["g"], lp["ln2"]["b"])
    for lp in params["dec"]:
        a1 = _ref_mha(lp["attn1"], trg, trg, trg, num_heads)
        trg = _ref_add_ln(trg, a1, lp["ln1"]["g"], lp["ln1"]["b"])
        a2 = _ref_mha(lp["attn2"], trg, src, src, num_heads)
        trg = _ref_add_ln(trg, a2, lp["ln2"]["g"], lp["ln2"]["b"])
        f = _ref_linear(_ref_linear(trg, lp["ffn"]["lin1"]["w"], lp["ffn"]["lin1"]["b"], relu=True),
                        lp["ffn"]["lin2"]["w"], lp["ffn"]["lin2"]["b"])
        trg = _ref_add_ln(trg, f, lp["ln3"]["g"], lp["ln3"]["b"])
    return _ref_linear(trg, params["fc"]["w"], params["fc"]["b"])


# ----------------------------------- main -------------------------------------

if __name__ == "__main__":
    # Small config: 2 encoder layers, 2 decoder layers, d_model=32, heads=4, d_ff=64.
    B, SEQ, D_MODEL, N_HEADS, D_FF = 2, 8, 32, 4, 64
    N_ENC, N_DEC, MAX_LEN = 2, 2, 512

    key = jax.random.PRNGKey(0)
    kp, ks, kt = jax.random.split(key, 3)
    params = init_transformer_params(kp, N_ENC, N_DEC, D_MODEL, D_FF, MAX_LEN)

    src = jax.random.normal(ks, (B, SEQ, D_MODEL), jnp.float32)
    trg = jax.random.normal(kt, (B, SEQ, D_MODEL), jnp.float32)

    fwd = jax.jit(functools.partial(transformer_forward, num_heads=N_HEADS))
    out = fwd(params, src, trg)
    out = jax.block_until_ready(out)

    ref = _ref_transformer(params, src, trg, N_HEADS)
    assert out.shape == (B, SEQ, D_MODEL)
    assert bool(jnp.all(jnp.isfinite(out)))
    # Tolerance relaxed slightly vs. 1e-4: the softmax denominator uses the EUP
    # approximate reciprocal (pl.reciprocal(approx=True)) inside the attention kernel.
    assert bool(jnp.allclose(out, ref, rtol=5e-3, atol=5e-3)), "mismatch vs JAX reference"

    print("KERNEL_OK")
</pallas_src>

<mosaic_0001>
module attributes {stable_mosaic.version = 11 : i64} {
  func.func @_linear_kernel(%arg0: i32, %arg1: i32, %arg2: i32, %arg3: memref<16x32xf32, #tpu.memory_space<vmem>>, %arg4: memref<32x96xf32, #tpu.memory_space<vmem>>, %arg5: memref<1x96xf32, #tpu.memory_space<vmem>>, %arg6: memref<16x96xf32, #tpu.memory_space<vmem>>, %arg7: memref<16x96xf32, #tpu.memory_space<vmem>>) attributes {dimension_semantics = [#tpu.dimension_semantics<parallel>, #tpu.dimension_semantics<parallel>, #tpu.dimension_semantics<arbitrary>], iteration_bounds = array<i64: 1, 1, 1>, scalar_prefetch = 0 : i64, scratch_operands = 1 : i64, tpu.core_type = #tpu.core_type<tc>, window_params = [{transform_indices = @transform_0, window_bounds = array<i64: 16, 32>}, {transform_indices = @transform_1, window_bounds = array<i64: 32, 96>}, {transform_indices = @transform_2, window_bounds = array<i64: 1, 96>}, {transform_indices = @transform_3, window_bounds = array<i64: 16, 96>}]} {
    %c0 = arith.constant 0 : index
    %c0_0 = arith.constant 0 : index
    %0 = vector.load %arg3[%c0, %c0_0] : memref<16x32xf32, #tpu.memory_space<vmem>>, vector<16x32xf32>
    %c0_1 = arith.constant 0 : index
    %c0_2 = arith.constant 0 : index
    %1 = vector.load %arg4[%c0_1, %c0_2] : memref<32x96xf32, #tpu.memory_space<vmem>>, vector<32x96xf32>
    %cst = arith.constant dense<0.000000e+00> : vector<16x96xf32>
    %2 = tpu.matmul %0, %1, %cst {dimension_numbers = #tpu.dot_dimension_numbers<[1], [0], [0], [1], [0, 0, 1, 1], [], []>} : vector<16x32xf32>, vector<32x96xf32>, vector<16x96xf32> -> vector<16x96xf32>
    %c0_i32 = arith.constant 0 : i32
    %3 = arith.cmpi eq, %arg2, %c0_i32 : i32
    %4 = arith.extui %3 : i1 to i32
    %c0_i32_3 = arith.constant 0 : i32
    %5 = arith.cmpi ne, %4, %c0_i32_3 : i32
    scf.if %5 {
      %c0_8 = arith.constant 0 : index
      %c0_9 = arith.constant 0 : index
      %12 = vector.load %arg7[%c0_8, %c0_9] : memref<16x96xf32, #tpu.memory_space<vmem>>, vector<16x96xf32>
      tpu.vector_store %arg7[%c0_8, %c0_9], %2 {strides = array<i32>} : memref<16x96xf32, #tpu.memory_space<vmem>>, vector<16x96xf32>,
    } else {
    }
    %c0_i32_4 = arith.constant 0 : i32
    %6 = arith.cmpi sgt, %arg2, %c0_i32_4 : i32
    %7 = arith.extui %6 : i1 to i32
    %c0_i32_5 = arith.constant 0 : i32
    %8 = arith.cmpi ne, %7, %c0_i32_5 : i32
    scf.if %8 {
      %c0_8 = arith.constant 0 : index
      %c0_9 = arith.constant 0 : index
      %12 = vector.load %arg7[%c0_8, %c0_9] : memref<16x96xf32, #tpu.memory_space<vmem>>, vector<16x96xf32>
      %13 = arith.addf %12, %2 : vector<16x96xf32>
      %c0_10 = arith.constant 0 : index
      %c0_11 = arith.constant 0 : index
      %14 = vector.load %arg7[%c0_10, %c0_11] : memref<16x96xf32, #tpu.memory_space<vmem>>, vector<16x96xf32>
      tpu.vector_store %arg7[%c0_10, %c0_11], %13 {strides = array<i32>} : memref<16x96xf32, #tpu.memory_space<vmem>>, vector<16x96xf32>,
    } else {
    }
    %c0_i32_6 = arith.constant 0 : i32
    %9 = arith.cmpi eq, %arg2, %c0_i32_6 : i32
    %10 = arith.extui %9 : i1 to i32
    %c0_i32_7 = arith.constant 0 : i32
    %11 = arith.cmpi ne, %10, %c0_i32_7 : i32
    scf.if %11 {
      %c0_8 = arith.constant 0 : index
      %c0_9 = arith.constant 0 : index
      %12 = vector.load %arg7[%c0_8, %c0_9] : memref<16x96xf32, #tpu.memory_space<vmem>>, vector<16x96xf32>
      %c0_10 = arith.constant 0 : index
      %c0_11 = arith.constant 0 : index
      %13 = vector.load %arg5[%c0_10, %c0_11] : memref<1x96xf32, #tpu.memory_space<vmem>>, vector<1x96xf32>
      %14 = vector.broadcast %13 : vector<1x96xf32> to vector<16x96xf32>
      %15 = arith.addf %12, %14 : vector<16x96xf32>
      %c0_12 = arith.constant 0 : index
      %c0_13 = arith.constant 0 : index
      %16 = vector.load %arg6[%c0_12, %c0_13] : memref<16x96xf32, #tpu.memory_space<vmem>>, vector<16x96xf32>
      tpu.vector_store %arg6[%c0_12, %c0_13], %15 {strides = array<i32>} : memref<16x96xf32, #tpu.memory_space<vmem>>, vector<16x96xf32>,
    } else {
    }
    return
  }
  func.func @transform_0(%arg0: i32, %arg1: i32, %arg2: i32) -> (i32, i32) {
    %c0_i32 = arith.constant 0 : i32
    return %arg0, %arg2 : i32, i32
  }
  func.func @transform_1(%arg0: i32, %arg1: i32, %arg2: i32) -> (i32, i32) {
    %c0_i32 = arith.constant 0 : i32
    return %arg2, %arg1 : i32, i32
  }
  func.func @transform_2(%arg0: i32, %arg1: i32, %arg2: i32) -> (i32, i32) {
    %c0_i32 = arith.constant 0 : i32
    %c0_i32_0 = arith.constant 0 : i32
    return %c0_i32, %arg1 : i32, i32
  }
  func.func @transform_3(%arg0: i32, %arg1: i32, %arg2: i32) -> (i32, i32) {
    %c0_i32 = arith.constant 0 : i32
    return %arg0, %arg1 : i32, i32
  }
}

module attributes {stable_mosaic.version = 11 : i64} {
  func.func @_attn_self_kernel(%arg0: i32, %arg1: memref<1x8x96xf32, #tpu.memory_space<vmem>>, %arg2: memref<1x8x32xf32, #tpu.memory_space<vmem>>) attributes {dimension_semantics = [#tpu.dimension_semantics<parallel>], iteration_bounds = array<i64: 2>, scalar_prefetch = 0 : i64, scratch_operands = 0 : i64, tpu.core_type = #tpu.core_type<tc>, window_params = [{transform_indices = @transform_0, window_bounds = array<i64: 1, 8, 96>}, {transform_indices = @transform_1, window_bounds = array<i64: 1, 8, 32>}]} {
    %c0 = arith.constant 0 : index
    %c0_0 = arith.constant 0 : index
    %c0_1 = arith.constant 0 : index
    %0 = vector.load %arg1[%c0, %c0_0, %c0_1] : memref<1x8x96xf32, #tpu.memory_space<vmem>>, vector<1x8x8xf32>
    %1 = vector.shape_cast %0 : vector<1x8x8xf32> to vector<8x8xf32>
    %cst = arith.constant 0.353553385 : f32
    %2 = vector.broadcast %cst : f32 to vector<8x8xf32>
    %3 = arith.mulf %1, %2 : vector<8x8xf32>
    %c0_2 = arith.constant 0 : index
    %c0_3 = arith.constant 0 : index
    %c32 = arith.constant 32 : index
    %4 = vector.load %arg1[%c0_2, %c0_3, %c32] : memref<1x8x96xf32, #tpu.memory_space<vmem>>, vector<1x8x8xf32>
    %5 = vector.shape_cast %4 : vector<1x8x8xf32> to vector<8x8xf32>
    %c0_4 = arith.constant 0 : index
    %c0_5 = arith.constant 0 : index
    %c64 = arith.constant 64 : index
    %6 = vector.load %arg1[%c0_4, %c0_5, %c64] : memref<1x8x96xf32, #tpu.memory_space<vmem>>, vector<1x8x8xf32>
    %7 = vector.shape_cast %6 : vector<1x8x8xf32> to vector<8x8xf32>
    %cst_6 = arith.constant dense<0.000000e+00> : vector<8x8xf32>
    %8 = tpu.matmul %3, %5, %cst_6 {dimension_numbers = #tpu.dot_dimension_numbers<[1], [1], [0], [0], [0, 0, 1, 0], [], []>} : vector<8x8xf32>, vector<8x8xf32>, vector<8x8xf32> -> vector<8x8xf32>
    %cst_7 = arith.constant dense<0xFF800000> : vector<8xf32>
    %9 = vector.multi_reduction <maximumf>, %8, %cst_7 [1] : vector<8x8xf32> to vector<8xf32>
    %10 = vector.shape_cast %9 : vector<8xf32> to vector<8x1xf32>
    %11 = vector.broadcast %10 : vector<8x1xf32> to vector<8x8xf32>
    %12 = arith.subf %8, %11 : vector<8x8xf32>
    %13 = math.exp %12 : vector<8x8xf32>
    %cst_8 = arith.constant dense<0.000000e+00> : vector<8xf32>
    %14 = vector.multi_reduction <add>, %13, %cst_8 [1] : vector<8x8xf32> to vector<8xf32>
    %15 = vector.shape_cast %14 : vector<8xf32> to vector<8x1xf32>
    %16 = tpu.reciprocal %15 {approx = true} : vector<8x1xf32> -> vector<8x1xf32>
    %17 = vector.broadcast %16 : vector<8x1xf32> to vector<8x8xf32>
    %18 = arith.mulf %13, %17 : vector<8x8xf32>
    %cst_9 = arith.constant dense<0.000000e+00> : vector<8x8xf32>
    %19 = tpu.matmul %18, %7, %cst_9 {dimension_numbers = #tpu.dot_dimension_numbers<[1], [0], [0], [1], [0, 0, 1, 1], [], []>} : vector<8x8xf32>, vector<8x8xf32>, vector<8x8xf32> -> vector<8x8xf32>
    %c0_10 = arith.constant 0 : index
    %c0_11 = arith.constant 0 : index
    %c8 = arith.constant 8 : index
    %20 = vector.load %arg1[%c0_10, %c0_11, %c8] : memref<1x8x96xf32, #tpu.memory_space<vmem>>, vector<1x8x8xf32>
    %21 = vector.shape_cast %20 : vector<1x8x8xf32> to vector<8x8xf32>
    %cst_12 = arith.constant 0.353553385 : f32
    %22 = vector.broadcast %cst_12 : f32 to vector<8x8xf32>
    %23 = arith.mulf %21, %22 : vector<8x8xf32>
    %c0_13 = arith.constant 0 : index
    %c0_14 = arith.constant 0 : index
    %c40 = arith.constant 40 : index
    %24 = vector.load %arg1[%c0_13, %c0_14, %c40] : memref<1x8x96xf32, #tpu.memory_space<vmem>>, vector<1x8x8xf32>
    %25 = vector.shape_cast %24 : vector<1x8x8xf32> to vector<8x8xf32>
    %c0_15 = arith.constant 0 : index
    %c0_16 = arith.constant 0 : index
    %c72 = arith.constant 72 : index
    %26 = vector.load %arg1[%c0_15, %c0_16, %c72] : memref<1x8x96xf32, #tpu.memory_space<vmem>>, vector<1x8x8xf32>
    %27 = vector.shape_cast %26 : vector<1x8x8xf32> to vector<8x8xf32>
    %cst_17 = arith.constant dense<0.000000e+00> : vector<8x8xf32>
    %28 = tpu.matmul %23, %25, %cst_17 {dimension_numbers = #tpu.dot_dimension_numbers<[1], [1], [0], [0], [0, 0, 1, 0], [], []>} : vector<8x8xf32>, vector<8x8xf32>, vector<8x8xf32> -> vector<8x8xf32>
    %cst_18 = arith.constant dense<0xFF800000> : vector<8xf32>
    %29 = vector.multi_reduction <maximumf>, %28, %cst_18 [1] : vector<8x8xf32> to vector<8xf32>
    %30 = vector.shape_cast %29 : vector<8xf32> to vector<8x1xf32>
    %31 = vector.broadcast %30 : vector<8x1xf32> to vector<8x8xf32>
    %32 = arith.subf %28, %31 : vector<8x8xf32>
    %33 = math.exp %32 : vector<8x8xf32>
    %cst_19 = arith.constant dense<0.000000e+00> : vector<8xf32>
    %34 = vector.multi_reduction <add>, %33, %cst_19 [1] : vector<8x8xf32> to vector<8xf32>
    %35 = vector.shape_cast %34 : vector<8xf32> to vector<8x1xf32>
    %36 = tpu.reciprocal %35 {approx = true} : vector<8x1xf32> -> vector<8x1xf32>
    %37 = vector.broadcast %36 : vector<8x1xf32> to vector<8x8xf32>
    %38 = arith.mulf %33, %37 : vector<8x8xf32>
    %cst_20 = arith.constant dense<0.000000e+00> : vector<8x8xf32>
    %39 = tpu.matmul %38, %27, %cst_20 {dimension_numbers = #tpu.dot_dimension_numbers<[1], [0], [0], [1], [0, 0, 1, 1], [], []>} : vector<8x8xf32>, vector<8x8xf32>, vector<8x8xf32> -> vector<8x8xf32>
    %c0_21 = arith.constant 0 : index
    %c0_22 = arith.constant 0 : index
    %c16 = arith.constant 16 : index
    %40 = vector.load %arg1[%c0_21, %c0_22, %c16] : memref<1x8x96xf32, #tpu.memory_space<vmem>>, vector<1x8x8xf32>
    %41 = vector.shape_cast %40 : vector<1x8x8xf32> to vector<8x8xf32>
    %cst_23 = arith.constant 0.353553385 : f32
    %42 = vector.broadcast %cst_23 : f32 to vector<8x8xf32>
    %43 = arith.mulf %41, %42 : vector<8x8xf32>
    %c0_24 = arith.constant 0 : index
    %c0_25 = arith.constant 0 : index
    %c48 = arith.constant 48 : index
    %44 = vector.load %arg1[%c0_24, %c0_25, %c48] : memref<1x8x96xf32, #tpu.memory_space<vmem>>, vector<1x8x8xf32>
    %45 = vector.shape_cast %44 : vector<1x8x8xf32> to vector<8x8xf32>
    %c0_26 = arith.constant 0 : index
    %c0_27 = arith.constant 0 : index
    %c80 = arith.constant 80 : index
    %46 = vector.load %arg1[%c0_26, %c0_27, %c80] : memref<1x8x96xf32, #tpu.memory_space<vmem>>, vector<1x8x8xf32>
    %47 = vector.shape_cast %46 : vector<1x8x8xf32> to vector<8x8xf32>
    %cst_28 = arith.constant dense<0.000000e+00> : vector<8x8xf32>
    %48 = tpu.matmul %43, %45, %cst_28 {dimension_numbers = #tpu.dot_dimension_numbers<[1], [1], [0], [0], [0, 0, 1, 0], [], []>} : vector<8x8xf32>, vector<8x8xf32>, vector<8x8xf32> -> vector<8x8xf32>
    %cst_29 = arith.constant dense<0xFF800000> : vector<8xf32>
    %49 = vector.multi_reduction <maximumf>, %48, %cst_29 [1] : vector<8x8xf32> to vector<8xf32>
    %50 = vector.shape_cast %49 : vector<8xf32> to vector<8x1xf32>
    %51 = vector.broadcast %50 : vector<8x1xf32> to vector<8x8xf32>
    %52 = arith.subf %48, %51 : vector<8x8xf32>
    %53 = math.exp %52 : vector<8x8xf32>
    %cst_30 = arith.constant dense<0.000000e+00> : vector<8xf32>
    %54 = vector.multi_reduction <add>, %53, %cst_30 [1] : vector<8x8xf32> to vector<8xf32>
    %55 = vector.shape_cast %54 : vector<8xf32> to vector<8x1xf32>
    %56 = tpu.reciprocal %55 {approx = true} : vector<8x1xf32> -> vector<8x1xf32>
    %57 = vector.broadcast %56 : vector<8x1xf32> to vector<8x8xf32>
    %58 = arith.mulf %53, %57 : vector<8x8xf32>
    %cst_31 = arith.constant dense<0.000000e+00> : vector<8x8xf32>
    %59 = tpu.matmul %58, %47, %cst_31 {dimension_numbers = #tpu.dot_dimension_numbers<[1], [0], [0], [1], [0, 0, 1, 1], [], []>} : vector<8x8xf32>, vector<8x8xf32>, vector<8x8xf32> -> vector<8x8xf32>
    %c0_32 = arith.constant 0 : index
    %c0_33 = arith.constant 0 : index
    %c24 = arith.constant 24 : index
    %60 = vector.load %arg1[%c0_32, %c0_33, %c24] : memref<1x8x96xf32, #tpu.memory_space<vmem>>, vector<1x8x8xf32>
    %61 = vector.shape_cast %60 : vector<1x8x8xf32> to vector<8x8xf32>
    %cst_34 = arith.constant 0.353553385 : f32
    %62 = vector.broadcast %cst_34 : f32 to vector<8x8xf32>
    %63 = arith.mulf %61, %62 : vector<8x8xf32>
    %c0_35 = arith.constant 0 : index
    %c0_36 = arith.constant 0 : index
    %c56 = arith.constant 56 : index
    %64 = vector.load %arg1[%c0_35, %c0_36, %c56] : memref<1x8x96xf32, #tpu.memory_space<vmem>>, vector<1x8x8xf32>
    %65 = vector.shape_cast %64 : vector<1x8x8xf32> to vector<8x8xf32>
    %c0_37 = arith.constant 0 : index
    %c0_38 = arith.constant 0 : index
    %c88 = arith.constant 88 : index
    %66 = vector.load %arg1[%c0_37, %c0_38, %c88] : memref<1x8x96xf32, #tpu.memory_space<vmem>>, vector<1x8x8xf32>
    %67 = vector.shape_cast %66 : vector<1x8x8xf32> to vector<8x8xf32>
    %cst_39 = arith.constant dense<0.000000e+00> : vector<8x8xf32>
    %68 = tpu.matmul %63, %65, %cst_39 {dimension_numbers = #tpu.dot_dimension_numbers<[1], [1], [0], [0], [0, 0, 1, 0], [], []>} : vector<8x8xf32>, vector<8x8xf32>, vector<8x8xf32> -> vector<8x8xf32>
    %cst_40 = arith.constant dense<0xFF800000> : vector<8xf32>
    %69 = vector.multi_reduction <maximumf>, %68, %cst_40 [1] : vector<8x8xf32> to vector<8xf32>
    %70 = vector.shape_cast %69 : vector<8xf32> to vector<8x1xf32>
    %71 = vector.broadcast %70 : vector<8x1xf32> to vector<8x8xf32>
    %72 = arith.subf %68, %71 : vector<8x8xf32>
    %73 = math.exp %72 : vector<8x8xf32>
    %cst_41 = arith.constant dense<0.000000e+00> : vector<8xf32>
    %74 = vector.multi_reduction <add>, %73, %cst_41 [1] : vector<8x8xf32> to vector<8xf32>
    %75 = vector.shape_cast %74 : vector<8xf32> to vector<8x1xf32>
    %76 = tpu.reciprocal %75 {approx = true} : vector<8x1xf32> -> vector<8x1xf32>
    %77 = vector.broadcast %76 : vector<8x1xf32> to vector<8x8xf32>
    %78 = arith.mulf %73, %77 : vector<8x8xf32>
    %cst_42 = arith.constant dense<0.000000e+00> : vector<8x8xf32>
    %79 = tpu.matmul %78, %67, %cst_42 {dimension_numbers = #tpu.dot_dimension_numbers<[1], [0], [0], [1], [0, 0, 1, 1], [], []>} : vector<8x8xf32>, vector<8x8xf32>, vector<8x8xf32> -> vector<8x8xf32>
    %80 = tpu.concatenate %19, %39, %59, %79 in 1 : vector<8x8xf32>, vector<8x8xf32>, vector<8x8xf32>, vector<8x8xf32> -> vector<8x32xf32>
    %c0_43 = arith.constant 0 : index
    %c0_44 = arith.constant 0 : index
    %c0_45 = arith.constant 0 : index
    %81 = vector.load %arg2[%c0_43, %c0_44, %c0_45] : memref<1x8x32xf32, #tpu.memory_space<vmem>>, vector<1x8x32xf32>
    %82 = vector.shape_cast %81 : vector<1x8x32xf32> to vector<8x32xf32>
    %83 = vector.shape_cast %80 : vector<8x32xf32> to vector<1x8x32xf32>
    tpu.vector_store %arg2[%c0_43, %c0_44, %c0_45], %83 {strides = array<i32>} : memref<1x8x32xf32, #tpu.memory_space<vmem>>, vector<1x8x32xf32>,
    return
  }
  func.func @transform_0(%arg0: i32) -> (i32, i32, i32) {
    %c0_i32 = arith.constant 0 : i32
    %c0_i32_0 = arith.constant 0 : i32
    %c0_i32_1 = arith.constant 0 : i32
    return %arg0, %c0_i32, %c0_i32_0 : i32, i32, i32
  }
  func.func @transform_1(%arg0: i32) -> (i32, i32, i32) {
    %c0_i32 = arith.constant 0 : i32
    %c0_i32_0 = arith.constant 0 : i32
    %c0_i32_1 = arith.constant 0 : i32
    return %arg0, %c0_i32, %c0_i32_0 : i32, i32, i32
  }
}

module attributes {stable_mosaic.version = 11 : i64} {
  func.func @_linear_add_ln_kernel(%arg0: i32, %arg1: i32, %arg2: memref<16x32xf32, #tpu.memory_space<vmem>>, %arg3: memref<32x32xf32, #tpu.memory_space<vmem>>, %arg4: memref<1x32xf32, #tpu.memory_space<vmem>>, %arg5: memref<16x32xf32, #tpu.memory_space<vmem>>, %arg6: memref<1x32xf32, #tpu.memory_space<vmem>>, %arg7: memref<1x32xf32, #tpu.memory_space<vmem>>, %arg8: memref<16x32xf32, #tpu.memory_space<vmem>>, %arg9: memref<16x32xf32, #tpu.memory_space<vmem>>) attributes {dimension_semantics = [#tpu.dimension_semantics<parallel>, #tpu.dimension_semantics<arbitrary>], iteration_bounds = array<i64: 1, 1>, scalar_prefetch = 0 : i64, scratch_operands = 1 : i64, tpu.core_type = #tpu.core_type<tc>, window_params = [{transform_indices = @transform_0, window_bounds = array<i64: 16, 32>}, {transform_indices = @transform_1, window_bounds = array<i64: 32, 32>}, {pipeline_mode = #tpu.pipeline_mode<synchronous>, transform_indices = @transform_2, window_bounds = array<i64: 1, 32>}, {transform_indices = @transform_3, window_bounds = array<i64: 16, 32>}, {pipeline_mode = #tpu.pipeline_mode<synchronous>, transform_indices = @transform_4, window_bounds = array<i64: 1, 32>}, {pipeline_mode = #tpu.pipeline_mode<synchronous>, transform_indices = @transform_5, window_bounds = array<i64: 1, 32>}, {transform_indices = @transform_6, window_bounds = array<i64: 16, 32>}]} {
    %c0 = arith.constant 0 : index
    %c0_0 = arith.constant 0 : index
    %0 = vector.load %arg2[%c0, %c0_0] : memref<16x32xf32, #tpu.memory_space<vmem>>, vector<16x32xf32>
    %c0_1 = arith.constant 0 : index
    %c0_2 = arith.constant 0 : index
    %1 = vector.load %arg3[%c0_1, %c0_2] : memref<32x32xf32, #tpu.memory_space<vmem>>, vector<32x32xf32>
    %cst = arith.constant dense<0.000000e+00> : vector<16x32xf32>
    %2 = tpu.matmul %0, %1, %cst {dimension_numbers = #tpu.dot_dimension_numbers<[1], [0], [0], [1], [0, 0, 1, 1], [], []>} : vector<16x32xf32>, vector<32x32xf32>, vector<16x32xf32> -> vector<16x32xf32>
    %c0_i32 = arith.constant 0 : i32
    %3 = arith.cmpi eq, %arg1, %c0_i32 : i32
    %4 = arith.extui %3 : i1 to i32
    %c0_i32_3 = arith.constant 0 : i32
    %5 = arith.cmpi ne, %4, %c0_i32_3 : i32
    scf.if %5 {
      %c0_8 = arith.constant 0 : index
      %c0_9 = arith.constant 0 : index
      %12 = vector.load %arg9[%c0_8, %c0_9] : memref<16x32xf32, #tpu.memory_space<vmem>>, vector<16x32xf32>
      tpu.vector_store %arg9[%c0_8, %c0_9], %2 {strides = array<i32>} : memref<16x32xf32, #tpu.memory_space<vmem>>, vector<16x32xf32>,
    } else {
    }
    %c0_i32_4 = arith.constant 0 : i32
    %6 = arith.cmpi sgt, %arg1, %c0_i32_4 : i32
    %7 = arith.extui %6 : i1 to i32
    %c0_i32_5 = arith.constant 0 : i32
    %8 = arith.cmpi ne, %7, %c0_i32_5 : i32
    scf.if %8 {
      %c0_8 = arith.constant 0 : index
      %c0_9 = arith.constant 0 : index
      %12 = vector.load %arg9[%c0_8, %c0_9] : memref<16x32xf32, #tpu.memory_space<vmem>>, vector<16x32xf32>
      %13 = arith.addf %12, %2 : vector<16x32xf32>
      %c0_10 = arith.constant 0 : index
      %c0_11 = arith.constant 0 : index
      %14 = vector.load %arg9[%c0_10, %c0_11] : memref<16x32xf32, #tpu.memory_space<vmem>>, vector<16x32xf32>
      tpu.vector_store %arg9[%c0_10, %c0_11], %13 {strides = array<i32>} : memref<16x32xf32, #tpu.memory_space<vmem>>, vector<16x32xf32>,
    } else {
    }
    %c0_i32_6 = arith.constant 0 : i32
    %9 = arith.cmpi eq, %arg1, %c0_i32_6 : i32
    %10 = arith.extui %9 : i1 to i32
    %c0_i32_7 = arith.constant 0 : i32
    %11 = arith.cmpi ne, %10, %c0_i32_7 : i32
    scf.if %11 {
      %c0_8 = arith.constant 0 : index
      %c0_9 = arith.constant 0 : index
      %12 = vector.load %arg9[%c0_8, %c0_9] : memref<16x32xf32, #tpu.memory_space<vmem>>, vector<16x32xf32>
      %c0_10 = arith.constant 0 : index
      %c0_11 = arith.constant 0 : index
      %13 = vector.load %arg4[%c0_10, %c0_11] : memref<1x32xf32, #tpu.memory_space<vmem>>, vector<1x32xf32>
      %14 = vector.broadcast %13 : vector<1x32xf32> to vector<16x32xf32>
      %15 = arith.addf %12, %14 : vector<16x32xf32>
      %c0_12 = arith.constant 0 : index
      %c0_13 = arith.constant 0 : index
      %16 = vector.load %arg5[%c0_12, %c0_13] : memref<16x32xf32, #tpu.memory_space<vmem>>, vector<16x32xf32>
      %17 = arith.addf %15, %16 : vector<16x32xf32>
      %cst_14 = arith.constant dense<0.000000e+00> : vector<16xf32>
      %18 = vector.multi_reduction <add>, %17, %cst_14 [1] : vector<16x32xf32> to vector<16xf32>
      %19 = vector.shape_cast %18 : vector<16xf32> to vector<16x1xf32>
      %cst_15 = arith.constant 3.200000e+01 : f32
      %20 = vector.broadcast %cst_15 : f32 to vector<16x1xf32>
      %21 = arith.divf %19, %20 : vector<16x1xf32>
      %22 = vector.broadcast %21 : vector<16x1xf32> to vector<16x32xf32>
      %23 = arith.subf %17, %22 : vector<16x32xf32>
      %24 = arith.mulf %23, %23 : vector<16x32xf32>
      %cst_16 = arith.constant dense<0.000000e+00> : vector<16xf32>
      %25 = vector.multi_reduction <add>, %24, %cst_16 [1] : vector<16x32xf32> to vector<16xf32>
      %26 = vector.shape_cast %25 : vector<16xf32> to vector<16x1xf32>
      %cst_17 = arith.constant 3.200000e+01 : f32
      %27 = vector.broadcast %cst_17 : f32 to vector<16x1xf32>
      %28 = arith.divf %26, %27 : vector<16x1xf32>
      %29 = vector.broadcast %21 : vector<16x1xf32> to vector<16x32xf32>
      %30 = arith.subf %17, %29 : vector<16x32xf32>
      %cst_18 = arith.constant 9.99999974E-6 : f32
      %31 = vector.broadcast %cst_18 : f32 to vector<16x1xf32>
      %32 = arith.addf %28, %31 : vector<16x1xf32>
      %33 = math.rsqrt %32 : vector<16x1xf32>
      %34 = vector.broadcast %33 : vector<16x1xf32> to vector<16x32xf32>
      %35 = arith.mulf %30, %34 : vector<16x32xf32>
      %c0_19 = arith.constant 0 : index
      %c0_20 = arith.constant 0 : index
      %36 = vector.load %arg6[%c0_19, %c0_20] : memref<1x32xf32, #tpu.memory_space<vmem>>, vector<1x32xf32>
      %37 = vector.broadcast %36 : vector<1x32xf32> to vector<16x32xf32>
      %38 = arith.mulf %35, %37 : vector<16x32xf32>
      %c0_21 = arith.constant 0 : index
      %c0_22 = arith.constant 0 : index
      %39 = vector.load %arg7[%c0_21, %c0_22] : memref<1x32xf32, #tpu.memory_space<vmem>>, vector<1x32xf32>
      %40 = vector.broadcast %39 : vector<1x32xf32> to vector<16x32xf32>
      %41 = arith.addf %38, %40 : vector<16x32xf32>
      %c0_23 = arith.constant 0 : index
      %c0_24 = arith.constant 0 : index
      %42 = vector.load %arg8[%c0_23, %c0_24] : memref<16x32xf32, #tpu.memory_space<vmem>>, vector<16x32xf32>
      tpu.vector_store %arg8[%c0_23, %c0_24], %41 {strides = array<i32>} : memref<16x32xf32, #tpu.memory_space<vmem>>, vector<16x32xf32>,
    } else {
    }
    return
  }
  func.func @transform_0(%arg0: i32, %arg1: i32) -> (i32, i32) {
    %c0_i32 = arith.constant 0 : i32
    return %arg0, %arg1 : i32, i32
  }
  func.func @transform_1(%arg0: i32, %arg1: i32) -> (i32, i32) {
    %c0_i32 = arith.constant 0 : i32
    %c0_i32_0 = arith.constant 0 : i32
    return %arg1, %c0_i32 : i32, i32
  }
  func.func @transform_2(%arg0: i32, %arg1: i32) -> (i32, i32) {
    %c0_i32 = arith.constant 0 : i32
    %c0_i32_0 = arith.constant 0 : i32
    %c0_i32_1 = arith.constant 0 : i32
    return %c0_i32, %c0_i32_0 : i32, i32
  }
  func.func @transform_3(%arg0: i32, %arg1: i32) -> (i32, i32) {
    %c0_i32 = arith.constant 0 : i32
    %c0_i32_0 = arith.constant 0 : i32
    return %arg0, %c0_i32 : i32, i32
  }
  func.func @transform_4(%arg0: i32, %arg1: i32) -> (i32, i32) {
    %c0_i32 = arith.constant 0 : i32
    %c0_i32_0 = arith.constant 0 : i32
    %c0_i32_1 = arith.constant 0 : i32
    return %c0_i32, %c0_i32_0 : i32, i32
  }
  func.func @transform_5(%arg0: i32, %arg1: i32) -> (i32, i32) {
    %c0_i32 = arith.constant 0 : i32
    %c0_i32_0 = arith.constant 0 : i32
    %c0_i32_1 = arith.constant 0 : i32
    return %c0_i32, %c0_i32_0 : i32, i32
  }
  func.func @transform_6(%arg0: i32, %arg1: i32) -> (i32, i32) {
    %c0_i32 = arith.constant 0 : i32
    %c0_i32_0 = arith.constant 0 : i32
    return %arg0, %c0_i32 : i32, i32
  }
}

module attributes {stable_mosaic.version = 11 : i64} {
  func.func @_ffn_add_ln_kernel(%arg0: i32, %arg1: i32, %arg2: memref<16x32xf32, #tpu.memory_space<vmem>>, %arg3: memref<32x64xf32, #tpu.memory_space<vmem>>, %arg4: memref<1x64xf32, #tpu.memory_space<vmem>>, %arg5: memref<64x32xf32, #tpu.memory_space<vmem>>, %arg6: memref<1x32xf32, #tpu.memory_space<vmem>>, %arg7: memref<1x32xf32, #tpu.memory_space<vmem>>, %arg8: memref<1x32xf32, #tpu.memory_space<vmem>>, %arg9: memref<16x32xf32, #tpu.memory_space<vmem>>, %arg10: memref<16x32xf32, #tpu.memory_space<vmem>>) attributes {dimension_semantics = [#tpu.dimension_semantics<parallel>, #tpu.dimension_semantics<arbitrary>], iteration_bounds = array<i64: 1, 1>, scalar_prefetch = 0 : i64, scratch_operands = 1 : i64, tpu.core_type = #tpu.core_type<tc>, window_params = [{transform_indices = @transform_0, window_bounds = array<i64: 16, 32>}, {transform_indices = @transform_1, window_bounds = array<i64: 32, 64>}, {transform_indices = @transform_2, window_bounds = array<i64: 1, 64>}, {transform_indices = @transform_3, window_bounds = array<i64: 64, 32>}, {pipeline_mode = #tpu.pipeline_mode<synchronous>, transform_indices = @transform_4, window_bounds = array<i64: 1, 32>}, {pipeline_mode = #tpu.pipeline_mode<synchronous>, transform_indices = @transform_5, window_bounds = array<i64: 1, 32>}, {pipeline_mode = #tpu.pipeline_mode<synchronous>, transform_indices = @transform_6, window_bounds = array<i64: 1, 32>}, {transform_indices = @transform_7, window_bounds = array<i64: 16, 32>}]} {
    %c0 = arith.constant 0 : index
    %c0_0 = arith.constant 0 : index
    %0 = vector.load %arg2[%c0, %c0_0] : memref<16x32xf32, #tpu.memory_space<vmem>>, vector<16x32xf32>
    %c0_1 = arith.constant 0 : index
    %c0_2 = arith.constant 0 : index
    %1 = vector.load %arg3[%c0_1, %c0_2] : memref<32x64xf32, #tpu.memory_space<vmem>>, vector<32x64xf32>
    %cst = arith.constant dense<0.000000e+00> : vector<16x64xf32>
    %2 = tpu.matmul %0, %1, %cst {dimension_numbers = #tpu.dot_dimension_numbers<[1], [0], [0], [1], [0, 0, 1, 1], [], []>} : vector<16x32xf32>, vector<32x64xf32>, vector<16x64xf32> -> vector<16x64xf32>
    %c0_3 = arith.constant 0 : index
    %c0_4 = arith.constant 0 : index
    %3 = vector.load %arg4[%c0_3, %c0_4] : memref<1x64xf32, #tpu.memory_space<vmem>>, vector<1x64xf32>
    %4 = vector.broadcast %3 : vector<1x64xf32> to vector<16x64xf32>
    %5 = arith.addf %2, %4 : vector<16x64xf32>
    %cst_5 = arith.constant 0.000000e+00 : f32
    %6 = vector.broadcast %cst_5 : f32 to vector<16x64xf32>
    %7 = arith.maximumf %5, %6 : vector<16x64xf32>
    %c0_6 = arith.constant 0 : index
    %c0_7 = arith.constant 0 : index
    %8 = vector.load %arg5[%c0_6, %c0_7] : memref<64x32xf32, #tpu.memory_space<vmem>>, vector<64x32xf32>
    %cst_8 = arith.constant dense<0.000000e+00> : vector<16x32xf32>
    %9 = tpu.matmul %7, %8, %cst_8 {dimension_numbers = #tpu.dot_dimension_numbers<[1], [0], [0], [1], [0, 0, 1, 1], [], []>} : vector<16x64xf32>, vector<64x32xf32>, vector<16x32xf32> -> vector<16x32xf32>
    %c0_i32 = arith.constant 0 : i32
    %10 = arith.cmpi eq, %arg1, %c0_i32 : i32
    %11 = arith.extui %10 : i1 to i32
    %c0_i32_9 = arith.constant 0 : i32
    %12 = arith.cmpi ne, %11, %c0_i32_9 : i32
    scf.if %12 {
      %c0_14 = arith.constant 0 : index
      %c0_15 = arith.constant 0 : index
      %19 = vector.load %arg10[%c0_14, %c0_15] : memref<16x32xf32, #tpu.memory_space<vmem>>, vector<16x32xf32>
      tpu.vector_store %arg10[%c0_14, %c0_15], %9 {strides = array<i32>} : memref<16x32xf32, #tpu.memory_space<vmem>>, vector<16x32xf32>,
    } else {
    }
    %c0_i32_10 = arith.constant 0 : i32
    %13 = arith.cmpi sgt, %arg1, %c0_i32_10 : i32
    %14 = arith.extui %13 : i1 to i32
    %c0_i32_11 = arith.constant 0 : i32
    %15 = arith.cmpi ne, %14, %c0_i32_11 : i32
    scf.if %15 {
      %c0_14 = arith.constant 0 : index
      %c0_15 = arith.constant 0 : index
      %19 = vector.load %arg10[%c0_14, %c0_15] : memref<16x32xf32, #tpu.memory_space<vmem>>, vector<16x32xf32>
      %20 = arith.addf %19, %9 : vector<16x32xf32>
      %c0_16 = arith.constant 0 : index
      %c0_17 = arith.constant 0 : index
      %21 = vector.load %arg10[%c0_16, %c0_17] : memref<16x32xf32, #tpu.memory_space<vmem>>, vector<16x32xf32>
      tpu.vector_store %arg10[%c0_16, %c0_17], %20 {strides = array<i32>} : memref<16x32xf32, #tpu.memory_space<vmem>>, vector<16x32xf32>,
    } else {
    }
    %c0_i32_12 = arith.constant 0 : i32
    %16 = arith.cmpi eq, %arg1, %c0_i32_12 : i32
    %17 = arith.extui %16 : i1 to i32
    %c0_i32_13 = arith.constant 0 : i32
    %18 = arith.cmpi ne, %17, %c0_i32_13 : i32
    scf.if %18 {
      %c0_14 = arith.constant 0 : index
      %c0_15 = arith.constant 0 : index
      %19 = vector.load %arg10[%c0_14, %c0_15] : memref<16x32xf32, #tpu.memory_space<vmem>>, vector<16x32xf32>
      %c0_16 = arith.constant 0 : index
      %c0_17 = arith.constant 0 : index
      %20 = vector.load %arg6[%c0_16, %c0_17] : memref<1x32xf32, #tpu.memory_space<vmem>>, vector<1x32xf32>
      %21 = vector.broadcast %20 : vector<1x32xf32> to vector<16x32xf32>
      %22 = arith.addf %19, %21 : vector<16x32xf32>
      %23 = arith.addf %22, %0 : vector<16x32xf32>
      %cst_18 = arith.constant dense<0.000000e+00> : vector<16xf32>
      %24 = vector.multi_reduction <add>, %23, %cst_18 [1] : vector<16x32xf32> to vector<16xf32>
      %25 = vector.shape_cast %24 : vector<16xf32> to vector<16x1xf32>
      %cst_19 = arith.constant 3.200000e+01 : f32
      %26 = vector.broadcast %cst_19 : f32 to vector<16x1xf32>
      %27 = arith.divf %25, %26 : vector<16x1xf32>
      %28 = vector.broadcast %27 : vector<16x1xf32> to vector<16x32xf32>
      %29 = arith.subf %23, %28 : vector<16x32xf32>
      %30 = arith.mulf %29, %29 : vector<16x32xf32>
      %cst_20 = arith.constant dense<0.000000e+00> : vector<16xf32>
      %31 = vector.multi_reduction <add>, %30, %cst_20 [1] : vector<16x32xf32> to vector<16xf32>
      %32 = vector.shape_cast %31 : vector<16xf32> to vector<16x1xf32>
      %cst_21 = arith.constant 3.200000e+01 : f32
      %33 = vector.broadcast %cst_21 : f32 to vector<16x1xf32>
      %34 = arith.divf %32, %33 : vector<16x1xf32>
      %35 = vector.broadcast %27 : vector<16x1xf32> to vector<16x32xf32>
      %36 = arith.subf %23, %35 : vector<16x32xf32>
      %cst_22 = arith.constant 9.99999974E-6 : f32
      %37 = vector.broadcast %cst_22 : f32 to vector<16x1xf32>
      %38 = arith.addf %34, %37 : vector<16x1xf32>
      %39 = math.rsqrt %38 : vector<16x1xf32>
      %40 = vector.broadcast %39 : vector<16x1xf32> to vector<16x32xf32>
      %41 = arith.mulf %36, %40 : vector<16x32xf32>
      %c0_23 = arith.constant 0 : index
      %c0_24 = arith.constant 0 : index
      %42 = vector.load %arg7[%c0_23, %c0_24] : memref<1x32xf32, #tpu.memory_space<vmem>>, vector<1x32xf32>
      %43 = vector.broadcast %42 : vector<1x32xf32> to vector<16x32xf32>
      %44 = arith.mulf %41, %43 : vector<16x32xf32>
      %c0_25 = arith.constant 0 : index
      %c0_26 = arith.constant 0 : index
      %45 = vector.load %arg8[%c0_25, %c0_26] : memref<1x32xf32, #tpu.memory_space<vmem>>, vector<1x32xf32>
      %46 = vector.broadcast %45 : vector<1x32xf32> to vector<16x32xf32>
      %47 = arith.addf %44, %46 : vector<16x32xf32>
      %c0_27 = arith.constant 0 : index
      %c0_28 = arith.constant 0 : index
      %48 = vector.load %arg9[%c0_27, %c0_28] : memref<16x32xf32, #tpu.memory_space<vmem>>, vector<16x32xf32>
      tpu.vector_store %arg9[%c0_27, %c0_28], %47 {strides = array<i32>} : memref<16x32xf32, #tpu.memory_space<vmem>>, vector<16x32xf32>,
    } else {
    }
    return
  }
  func.func @transform_0(%arg0: i32, %arg1: i32) -> (i32, i32) {
    %c0_i32 = arith.constant 0 : i32
    %c0_i32_0 = arith.constant 0 : i32
    return %arg0, %c0_i32 : i32, i32
  }
  func.func @transform_1(%arg0: i32, %arg1: i32) -> (i32, i32) {
    %c0_i32 = arith.constant 0 : i32
    %c0_i32_0 = arith.constant 0 : i32
    return %c0_i32, %arg1 : i32, i32
  }
  func.func @transform_2(%arg0: i32, %arg1: i32) -> (i32, i32) {
    %c0_i32 = arith.constant 0 : i32
    %c0_i32_0 = arith.constant 0 : i32
    return %c0_i32, %arg1 : i32, i32
  }
  func.func @transform_3(%arg0: i32, %arg1: i32) -> (i32, i32) {
    %c0_i32 = arith.constant 0 : i32
    %c0_i32_0 = arith.constant 0 : i32
    return %arg1, %c0_i32 : i32, i32
  }
  func.func @transform_4(%arg0: i32, %arg1: i32) -> (i32, i32) {
    %c0_i32 = arith.constant 0 : i32
    %c0_i32_0 = arith.constant 0 : i32
    %c0_i32_1 = arith.constant 0 : i32
    return %c0_i32, %c0_i32_0 : i32, i32
  }
  func.func @transform_5(%arg0: i32, %arg1: i32) -> (i32, i32) {
    %c0_i32 = arith.constant 0 : i32
    %c0_i32_0 = arith.constant 0 : i32
    %c0_i32_1 = arith.constant 0 : i32
    return %c0_i32, %c0_i32_0 : i32, i32
  }
  func.func @transform_6(%arg0: i32, %arg1: i32) -> (i32, i32) {
    %c0_i32 = arith.constant 0 : i32
    %c0_i32_0 = arith.constant 0 : i32
    %c0_i32_1 = arith.constant 0 : i32
    return %c0_i32, %c0_i32_0 : i32, i32
  }
  func.func @transform_7(%arg0: i32, %arg1: i32) -> (i32, i32) {
    %c0_i32 = arith.constant 0 : i32
    %c0_i32_0 = arith.constant 0 : i32
    return %arg0, %c0_i32 : i32, i32
  }
}

module attributes {stable_mosaic.version = 11 : i64} {
  func.func @_linear_kernel(%arg0: i32, %arg1: i32, %arg2: i32, %arg3: memref<16x32xf32, #tpu.memory_space<vmem>>, %arg4: memref<32x64xf32, #tpu.memory_space<vmem>>, %arg5: memref<1x64xf32, #tpu.memory_space<vmem>>, %arg6: memref<16x64xf32, #tpu.memory_space<vmem>>, %arg7: memref<16x64xf32, #tpu.memory_space<vmem>>) attributes {dimension_semantics = [#tpu.dimension_semantics<parallel>, #tpu.dimension_semantics<parallel>, #tpu.dimension_semantics<arbitrary>], iteration_bounds = array<i64: 1, 1, 1>, scalar_prefetch = 0 : i64, scratch_operands = 1 : i64, tpu.core_type = #tpu.core_type<tc>, window_params = [{transform_indices = @transform_0, window_bounds = array<i64: 16, 32>}, {transform_indices = @transform_1, window_bounds = array<i64: 32, 64>}, {transform_indices = @transform_2, window_bounds = array<i64: 1, 64>}, {transform_indices = @transform_3, window_bounds = array<i64: 16, 64>}]} {
    %c0 = arith.constant 0 : index
    %c0_0 = arith.constant 0 : index
    %0 = vector.load %arg3[%c0, %c0_0] : memref<16x32xf32, #tpu.memory_space<vmem>>, vector<16x32xf32>
    %c0_1 = arith.constant 0 : index
    %c0_2 = arith.constant 0 : index
    %1 = vector.load %arg4[%c0_1, %c0_2] : memref<32x64xf32, #tpu.memory_space<vmem>>, vector<32x64xf32>
    %cst = arith.constant dense<0.000000e+00> : vector<16x64xf32>
    %2 = tpu.matmul %0, %1, %cst {dimension_numbers = #tpu.dot_dimension_numbers<[1], [0], [0], [1], [0, 0, 1, 1], [], []>} : vector<16x32xf32>, vector<32x64xf32>, vector<16x64xf32> -> vector<16x64xf32>
    %c0_i32 = arith.constant 0 : i32
    %3 = arith.cmpi eq, %arg2, %c0_i32 : i32
    %4 = arith.extui %3 : i1 to i32
    %c0_i32_3 = arith.constant 0 : i32
    %5 = arith.cmpi ne, %4, %c0_i32_3 : i32
    scf.if %5 {
      %c0_8 = arith.constant 0 : index
      %c0_9 = arith.constant 0 : index
      %12 = vector.load %arg7[%c0_8, %c0_9] : memref<16x64xf32, #tpu.memory_space<vmem>>, vector<16x64xf32>
      tpu.vector_store %arg7[%c0_8, %c0_9], %2 {strides = array<i32>} : memref<16x64xf32, #tpu.memory_space<vmem>>, vector<16x64xf32>,
    } else {
    }
    %c0_i32_4 = arith.constant 0 : i32
    %6 = arith.cmpi sgt, %arg2, %c0_i32_4 : i32
    %7 = arith.extui %6 : i1 to i32
    %c0_i32_5 = arith.constant 0 : i32
    %8 = arith.cmpi ne, %7, %c0_i32_5 : i32
    scf.if %8 {
      %c0_8 = arith.constant 0 : index
      %c0_9 = arith.constant 0 : index
      %12 = vector.load %arg7[%c0_8, %c0_9] : memref<16x64xf32, #tpu.memory_space<vmem>>, vector<16x64xf32>
      %13 = arith.addf %12, %2 : vector<16x64xf32>
      %c0_10 = arith.constant 0 : index
      %c0_11 = arith.constant 0 : index
      %14 = vector.load %arg7[%c0_10, %c0_11] : memref<16x64xf32, #tpu.memory_space<vmem>>, vector<16x64xf32>
      tpu.vector_store %arg7[%c0_10, %c0_11], %13 {strides = array<i32>} : memref<16x64xf32, #tpu.memory_space<vmem>>, vector<16x64xf32>,
    } else {
    }
    %c0_i32_6 = arith.constant 0 : i32
    %9 = arith.cmpi eq, %arg2, %c0_i32_6 : i32
    %10 = arith.extui %9 : i1 to i32
    %c0_i32_7 = arith.constant 0 : i32
    %11 = arith.cmpi ne, %10, %c0_i32_7 : i32
    scf.if %11 {
      %c0_8 = arith.constant 0 : index
      %c0_9 = arith.constant 0 : index
      %12 = vector.load %arg7[%c0_8, %c0_9] : memref<16x64xf32, #tpu.memory_space<vmem>>, vector<16x64xf32>
      %c0_10 = arith.constant 0 : index
      %c0_11 = arith.constant 0 : index
      %13 = vector.load %arg5[%c0_10, %c0_11] : memref<1x64xf32, #tpu.memory_space<vmem>>, vector<1x64xf32>
      %14 = vector.broadcast %13 : vector<1x64xf32> to vector<16x64xf32>
      %15 = arith.addf %12, %14 : vector<16x64xf32>
      %c0_12 = arith.constant 0 : index
      %c0_13 = arith.constant 0 : index
      %16 = vector.load %arg6[%c0_12, %c0_13] : memref<16x64xf32, #tpu.memory_space<vmem>>, vector<16x64xf32>
      tpu.vector_store %arg6[%c0_12, %c0_13], %15 {strides = array<i32>} : memref<16x64xf32, #tpu.memory_space<vmem>>, vector<16x64xf32>,
    } else {
    }
    return
  }
  func.func @transform_0(%arg0: i32, %arg1: i32, %arg2: i32) -> (i32, i32) {
    %c0_i32 = arith.constant 0 : i32
    return %arg0, %arg2 : i32, i32
  }
  func.func @transform_1(%arg0: i32, %arg1: i32, %arg2: i32) -> (i32, i32) {
    %c0_i32 = arith.constant 0 : i32
    return %arg2, %arg1 : i32, i32
  }
  func.func @transform_2(%arg0: i32, %arg1: i32, %arg2: i32) -> (i32, i32) {
    %c0_i32 = arith.constant 0 : i32
    %c0_i32_0 = arith.constant 0 : i32
    return %c0_i32, %arg1 : i32, i32
  }
  func.func @transform_3(%arg0: i32, %arg1: i32, %arg2: i32) -> (i32, i32) {
    %c0_i32 = arith.constant 0 : i32
    return %arg0, %arg1 : i32, i32
  }
}

module attributes {stable_mosaic.version = 11 : i64} {
  func.func @_linear_kernel(%arg0: i32, %arg1: i32, %arg2: i32, %arg3: memref<16x32xf32, #tpu.memory_space<vmem>>, %arg4: memref<32x32xf32, #tpu.memory_space<vmem>>, %arg5: memref<1x32xf32, #tpu.memory_space<vmem>>, %arg6: memref<16x32xf32, #tpu.memory_space<vmem>>, %arg7: memref<16x32xf32, #tpu.memory_space<vmem>>) attributes {dimension_semantics = [#tpu.dimension_semantics<parallel>, #tpu.dimension_semantics<parallel>, #tpu.dimension_semantics<arbitrary>], iteration_bounds = array<i64: 1, 1, 1>, scalar_prefetch = 0 : i64, scratch_operands = 1 : i64, tpu.core_type = #tpu.core_type<tc>, window_params = [{transform_indices = @transform_0, window_bounds = array<i64: 16, 32>}, {transform_indices = @transform_1, window_bounds = array<i64: 32, 32>}, {transform_indices = @transform_2, window_bounds = array<i64: 1, 32>}, {transform_indices = @transform_3, window_bounds = array<i64: 16, 32>}]} {
    %c0 = arith.constant 0 : index
    %c0_0 = arith.constant 0 : index
    %0 = vector.load %arg3[%c0, %c0_0] : memref<16x32xf32, #tpu.memory_space<vmem>>, vector<16x32xf32>
    %c0_1 = arith.constant 0 : index
    %c0_2 = arith.constant 0 : index
    %1 = vector.load %arg4[%c0_1, %c0_2] : memref<32x32xf32, #tpu.memory_space<vmem>>, vector<32x32xf32>
    %cst = arith.constant dense<0.000000e+00> : vector<16x32xf32>
    %2 = tpu.matmul %0, %1, %cst {dimension_numbers = #tpu.dot_dimension_numbers<[1], [0], [0], [1], [0, 0, 1, 1], [], []>} : vector<16x32xf32>, vector<32x32xf32>, vector<16x32xf32> -> vector<16x32xf32>
    %c0_i32 = arith.constant 0 : i32
    %3 = arith.cmpi eq, %arg2, %c0_i32 : i32
    %4 = arith.extui %3 : i1 to i32
    %c0_i32_3 = arith.constant 0 : i32
    %5 = arith.cmpi ne, %4, %c0_i32_3 : i32
    scf.if %5 {
      %c0_8 = arith.constant 0 : index
      %c0_9 = arith.constant 0 : index
      %12 = vector.load %arg7[%c0_8, %c0_9] : memref<16x32xf32, #tpu.memory_space<vmem>>, vector<16x32xf32>
      tpu.vector_store %arg7[%c0_8, %c0_9], %2 {strides = array<i32>} : memref<16x32xf32, #tpu.memory_space<vmem>>, vector<16x32xf32>,
    } else {
    }
    %c0_i32_4 = arith.constant 0 : i32
    %6 = arith.cmpi sgt, %arg2, %c0_i32_4 : i32
    %7 = arith.extui %6 : i1 to i32
    %c0_i32_5 = arith.constant 0 : i32
    %8 = arith.cmpi ne, %7, %c0_i32_5 : i32
    scf.if %8 {
      %c0_8 = arith.constant 0 : index
      %c0_9 = arith.constant 0 : index
      %12 = vector.load %arg7[%c0_8, %c0_9] : memref<16x32xf32, #tpu.memory_space<vmem>>, vector<16x32xf32>
      %13 = arith.addf %12, %2 : vector<16x32xf32>
      %c0_10 = arith.constant 0 : index
      %c0_11 = arith.constant 0 : index
      %14 = vector.load %arg7[%c0_10, %c0_11] : memref<16x32xf32, #tpu.memory_space<vmem>>, vector<16x32xf32>
      tpu.vector_store %arg7[%c0_10, %c0_11], %13 {strides = array<i32>} : memref<16x32xf32, #tpu.memory_space<vmem>>, vector<16x32xf32>,
    } else {
    }
    %c0_i32_6 = arith.constant 0 : i32
    %9 = arith.cmpi eq, %arg2, %c0_i32_6 : i32
    %10 = arith.extui %9 : i1 to i32
    %c0_i32_7 = arith.constant 0 : i32
    %11 = arith.cmpi ne, %10, %c0_i32_7 : i32
    scf.if %11 {
      %c0_8 = arith.constant 0 : index
      %c0_9 = arith.constant 0 : index
      %12 = vector.load %arg7[%c0_8, %c0_9] : memref<16x32xf32, #tpu.memory_space<vmem>>, vector<16x32xf32>
      %c0_10 = arith.constant 0 : index
      %c0_11 = arith.constant 0 : index
      %13 = vector.load %arg5[%c0_10, %c0_11] : memref<1x32xf32, #tpu.memory_space<vmem>>, vector<1x32xf32>
      %14 = vector.broadcast %13 : vector<1x32xf32> to vector<16x32xf32>
      %15 = arith.addf %12, %14 : vector<16x32xf32>
      %c0_12 = arith.constant 0 : index
      %c0_13 = arith.constant 0 : index
      %16 = vector.load %arg6[%c0_12, %c0_13] : memref<16x32xf32, #tpu.memory_space<vmem>>, vector<16x32xf32>
      tpu.vector_store %arg6[%c0_12, %c0_13], %15 {strides = array<i32>} : memref<16x32xf32, #tpu.memory_space<vmem>>, vector<16x32xf32>,
    } else {
    }
    return
  }
  func.func @transform_0(%arg0: i32, %arg1: i32, %arg2: i32) -> (i32, i32) {
    %c0_i32 = arith.constant 0 : i32
    return %arg0, %arg2 : i32, i32
  }
  func.func @transform_1(%arg0: i32, %arg1: i32, %arg2: i32) -> (i32, i32) {
    %c0_i32 = arith.constant 0 : i32
    return %arg2, %arg1 : i32, i32
  }
  func.func @transform_2(%arg0: i32, %arg1: i32, %arg2: i32) -> (i32, i32) {
    %c0_i32 = arith.constant 0 : i32
    %c0_i32_0 = arith.constant 0 : i32
    return %c0_i32, %arg1 : i32, i32
  }
  func.func @transform_3(%arg0: i32, %arg1: i32, %arg2: i32) -> (i32, i32) {
    %c0_i32 = arith.constant 0 : i32
    return %arg0, %arg1 : i32, i32
  }
}

module attributes {stable_mosaic.version = 11 : i64} {
  func.func @_attn_cross_kernel(%arg0: i32, %arg1: memref<1x8x32xf32, #tpu.memory_space<vmem>>, %arg2: memref<1x8x64xf32, #tpu.memory_space<vmem>>, %arg3: memref<1x8x32xf32, #tpu.memory_space<vmem>>) attributes {dimension_semantics = [#tpu.dimension_semantics<parallel>], iteration_bounds = array<i64: 2>, scalar_prefetch = 0 : i64, scratch_operands = 0 : i64, tpu.core_type = #tpu.core_type<tc>, window_params = [{transform_indices = @transform_0, window_bounds = array<i64: 1, 8, 32>}, {transform_indices = @transform_1, window_bounds = array<i64: 1, 8, 64>}, {transform_indices = @transform_2, window_bounds = array<i64: 1, 8, 32>}]} {
    %c0 = arith.constant 0 : index
    %c0_0 = arith.constant 0 : index
    %c0_1 = arith.constant 0 : index
    %0 = vector.load %arg1[%c0, %c0_0, %c0_1] : memref<1x8x32xf32, #tpu.memory_space<vmem>>, vector<1x8x8xf32>
    %1 = vector.shape_cast %0 : vector<1x8x8xf32> to vector<8x8xf32>
    %cst = arith.constant 0.353553385 : f32
    %2 = vector.broadcast %cst : f32 to vector<8x8xf32>
    %3 = arith.mulf %1, %2 : vector<8x8xf32>
    %c0_2 = arith.constant 0 : index
    %c0_3 = arith.constant 0 : index
    %c0_4 = arith.constant 0 : index
    %4 = vector.load %arg2[%c0_2, %c0_3, %c0_4] : memref<1x8x64xf32, #tpu.memory_space<vmem>>, vector<1x8x8xf32>
    %5 = vector.shape_cast %4 : vector<1x8x8xf32> to vector<8x8xf32>
    %c0_5 = arith.constant 0 : index
    %c0_6 = arith.constant 0 : index
    %c32 = arith.constant 32 : index
    %6 = vector.load %arg2[%c0_5, %c0_6, %c32] : memref<1x8x64xf32, #tpu.memory_space<vmem>>, vector<1x8x8xf32>
    %7 = vector.shape_cast %6 : vector<1x8x8xf32> to vector<8x8xf32>
    %cst_7 = arith.constant dense<0.000000e+00> : vector<8x8xf32>
    %8 = tpu.matmul %3, %5, %cst_7 {dimension_numbers = #tpu.dot_dimension_numbers<[1], [1], [0], [0], [0, 0, 1, 0], [], []>} : vector<8x8xf32>, vector<8x8xf32>, vector<8x8xf32> -> vector<8x8xf32>
    %cst_8 = arith.constant dense<0xFF800000> : vector<8xf32>
    %9 = vector.multi_reduction <maximumf>, %8, %cst_8 [1] : vector<8x8xf32> to vector<8xf32>
    %10 = vector.shape_cast %9 : vector<8xf32> to vector<8x1xf32>
    %11 = vector.broadcast %10 : vector<8x1xf32> to vector<8x8xf32>
    %12 = arith.subf %8, %11 : vector<8x8xf32>
    %13 = math.exp %12 : vector<8x8xf32>
    %cst_9 = arith.constant dense<0.000000e+00> : vector<8xf32>
    %14 = vector.multi_reduction <add>, %13, %cst_9 [1] : vector<8x8xf32> to vector<8xf32>
    %15 = vector.shape_cast %14 : vector<8xf32> to vector<8x1xf32>
    %16 = tpu.reciprocal %15 {approx = true} : vector<8x1xf32> -> vector<8x1xf32>
    %17 = vector.broadcast %16 : vector<8x1xf32> to vector<8x8xf32>
    %18 = arith.mulf %13, %17 : vector<8x8xf32>
    %cst_10 = arith.constant dense<0.000000e+00> : vector<8x8xf32>
    %19 = tpu.matmul %18, %7, %cst_10 {dimension_numbers = #tpu.dot_dimension_numbers<[1], [0], [0], [1], [0, 0, 1, 1], [], []>} : vector<8x8xf32>, vector<8x8xf32>, vector<8x8xf32> -> vector<8x8xf32>
    %c0_11 = arith.constant 0 : index
    %c0_12 = arith.constant 0 : index
    %c8 = arith.constant 8 : index
    %20 = vector.load %arg1[%c0_11, %c0_12, %c8] : memref<1x8x32xf32, #tpu.memory_space<vmem>>, vector<1x8x8xf32>
    %21 = vector.shape_cast %20 : vector<1x8x8xf32> to vector<8x8xf32>
    %cst_13 = arith.constant 0.353553385 : f32
    %22 = vector.broadcast %cst_13 : f32 to vector<8x8xf32>
    %23 = arith.mulf %21, %22 : vector<8x8xf32>
    %c0_14 = arith.constant 0 : index
    %c0_15 = arith.constant 0 : index
    %c8_16 = arith.constant 8 : index
    %24 = vector.load %arg2[%c0_14, %c0_15, %c8_16] : memref<1x8x64xf32, #tpu.memory_space<vmem>>, vector<1x8x8xf32>
    %25 = vector.shape_cast %24 : vector<1x8x8xf32> to vector<8x8xf32>
    %c0_17 = arith.constant 0 : index
    %c0_18 = arith.constant 0 : index
    %c40 = arith.constant 40 : index
    %26 = vector.load %arg2[%c0_17, %c0_18, %c40] : memref<1x8x64xf32, #tpu.memory_space<vmem>>, vector<1x8x8xf32>
    %27 = vector.shape_cast %26 : vector<1x8x8xf32> to vector<8x8xf32>
    %cst_19 = arith.constant dense<0.000000e+00> : vector<8x8xf32>
    %28 = tpu.matmul %23, %25, %cst_19 {dimension_numbers = #tpu.dot_dimension_numbers<[1], [1], [0], [0], [0, 0, 1, 0], [], []>} : vector<8x8xf32>, vector<8x8xf32>, vector<8x8xf32> -> vector<8x8xf32>
    %cst_20 = arith.constant dense<0xFF800000> : vector<8xf32>
    %29 = vector.multi_reduction <maximumf>, %28, %cst_20 [1] : vector<8x8xf32> to vector<8xf32>
    %30 = vector.shape_cast %29 : vector<8xf32> to vector<8x1xf32>
    %31 = vector.broadcast %30 : vector<8x1xf32> to vector<8x8xf32>
    %32 = arith.subf %28, %31 : vector<8x8xf32>
    %33 = math.exp %32 : vector<8x8xf32>
    %cst_21 = arith.constant dense<0.000000e+00> : vector<8xf32>
    %34 = vector.multi_reduction <add>, %33, %cst_21 [1] : vector<8x8xf32> to vector<8xf32>
    %35 = vector.shape_cast %34 : vector<8xf32> to vector<8x1xf32>
    %36 = tpu.reciprocal %35 {approx = true} : vector<8x1xf32> -> vector<8x1xf32>
    %37 = vector.broadcast %36 : vector<8x1xf32> to vector<8x8xf32>
    %38 = arith.mulf %33, %37 : vector<8x8xf32>
    %cst_22 = arith.constant dense<0.000000e+00> : vector<8x8xf32>
    %39 = tpu.matmul %38, %27, %cst_22 {dimension_numbers = #tpu.dot_dimension_numbers<[1], [0], [0], [1], [0, 0, 1, 1], [], []>} : vector<8x8xf32>, vector<8x8xf32>, vector<8x8xf32> -> vector<8x8xf32>
    %c0_23 = arith.constant 0 : index
    %c0_24 = arith.constant 0 : index
    %c16 = arith.constant 16 : index
    %40 = vector.load %arg1[%c0_23, %c0_24, %c16] : memref<1x8x32xf32, #tpu.memory_space<vmem>>, vector<1x8x8xf32>
    %41 = vector.shape_cast %40 : vector<1x8x8xf32> to vector<8x8xf32>
    %cst_25 = arith.constant 0.353553385 : f32
    %42 = vector.broadcast %cst_25 : f32 to vector<8x8xf32>
    %43 = arith.mulf %41, %42 : vector<8x8xf32>
    %c0_26 = arith.constant 0 : index
    %c0_27 = arith.constant 0 : index
    %c16_28 = arith.constant 16 : index
    %44 = vector.load %arg2[%c0_26, %c0_27, %c16_28] : memref<1x8x64xf32, #tpu.memory_space<vmem>>, vector<1x8x8xf32>
    %45 = vector.shape_cast %44 : vector<1x8x8xf32> to vector<8x8xf32>
    %c0_29 = arith.constant 0 : index
    %c0_30 = arith.constant 0 : index
    %c48 = arith.constant 48 : index
    %46 = vector.load %arg2[%c0_29, %c0_30, %c48] : memref<1x8x64xf32, #tpu.memory_space<vmem>>, vector<1x8x8xf32>
    %47 = vector.shape_cast %46 : vector<1x8x8xf32> to vector<8x8xf32>
    %cst_31 = arith.constant dense<0.000000e+00> : vector<8x8xf32>
    %48 = tpu.matmul %43, %45, %cst_31 {dimension_numbers = #tpu.dot_dimension_numbers<[1], [1], [0], [0], [0, 0, 1, 0], [], []>} : vector<8x8xf32>, vector<8x8xf32>, vector<8x8xf32> -> vector<8x8xf32>
    %cst_32 = arith.constant dense<0xFF800000> : vector<8xf32>
    %49 = vector.multi_reduction <maximumf>, %48, %cst_32 [1] : vector<8x8xf32> to vector<8xf32>
    %50 = vector.shape_cast %49 : vector<8xf32> to vector<8x1xf32>
    %51 = vector.broadcast %50 : vector<8x1xf32> to vector<8x8xf32>
    %52 = arith.subf %48, %51 : vector<8x8xf32>
    %53 = math.exp %52 : vector<8x8xf32>
    %cst_33 = arith.constant dense<0.000000e+00> : vector<8xf32>
    %54 = vector.multi_reduction <add>, %53, %cst_33 [1] : vector<8x8xf32> to vector<8xf32>
    %55 = vector.shape_cast %54 : vector<8xf32> to vector<8x1xf32>
    %56 = tpu.reciprocal %55 {approx = true} : vector<8x1xf32> -> vector<8x1xf32>
    %57 = vector.broadcast %56 : vector<8x1xf32> to vector<8x8xf32>
    %58 = arith.mulf %53, %57 : vector<8x8xf32>
    %cst_34 = arith.constant dense<0.000000e+00> : vector<8x8xf32>
    %59 = tpu.matmul %58, %47, %cst_34 {dimension_numbers = #tpu.dot_dimension_numbers<[1], [0], [0], [1], [0, 0, 1, 1], [], []>} : vector<8x8xf32>, vector<8x8xf32>, vector<8x8xf32> -> vector<8x8xf32>
    %c0_35 = arith.constant 0 : index
    %c0_36 = arith.constant 0 : index
    %c24 = arith.constant 24 : index
    %60 = vector.load %arg1[%c0_35, %c0_36, %c24] : memref<1x8x32xf32, #tpu.memory_space<vmem>>, vector<1x8x8xf32>
    %61 = vector.shape_cast %60 : vector<1x8x8xf32> to vector<8x8xf32>
    %cst_37 = arith.constant 0.353553385 : f32
    %62 = vector.broadcast %cst_37 : f32 to vector<8x8xf32>
    %63 = arith.mulf %61, %62 : vector<8x8xf32>
    %c0_38 = arith.constant 0 : index
    %c0_39 = arith.constant 0 : index
    %c24_40 = arith.constant 24 : index
    %64 = vector.load %arg2[%c0_38, %c0_39, %c24_40] : memref<1x8x64xf32, #tpu.memory_space<vmem>>, vector<1x8x8xf32>
    %65 = vector.shape_cast %64 : vector<1x8x8xf32> to vector<8x8xf32>
    %c0_41 = arith.constant 0 : index
    %c0_42 = arith.constant 0 : index
    %c56 = arith.constant 56 : index
    %66 = vector.load %arg2[%c0_41, %c0_42, %c56] : memref<1x8x64xf32, #tpu.memory_space<vmem>>, vector<1x8x8xf32>
    %67 = vector.shape_cast %66 : vector<1x8x8xf32> to vector<8x8xf32>
    %cst_43 = arith.constant dense<0.000000e+00> : vector<8x8xf32>
    %68 = tpu.matmul %63, %65, %cst_43 {dimension_numbers = #tpu.dot_dimension_numbers<[1], [1], [0], [0], [0, 0, 1, 0], [], []>} : vector<8x8xf32>, vector<8x8xf32>, vector<8x8xf32> -> vector<8x8xf32>
    %cst_44 = arith.constant dense<0xFF800000> : vector<8xf32>
    %69 = vector.multi_reduction <maximumf>, %68, %cst_44 [1] : vector<8x8xf32> to vector<8xf32>
    %70 = vector.shape_cast %69 : vector<8xf32> to vector<8x1xf32>
    %71 = vector.broadcast %70 : vector<8x1xf32> to vector<8x8xf32>
    %72 = arith.subf %68, %71 : vector<8x8xf32>
    %73 = math.exp %72 : vector<8x8xf32>
    %cst_45 = arith.constant dense<0.000000e+00> : vector<8xf32>
    %74 = vector.multi_reduction <add>, %73, %cst_45 [1] : vector<8x8xf32> to vector<8xf32>
    %75 = vector.shape_cast %74 : vector<8xf32> to vector<8x1xf32>
    %76 = tpu.reciprocal %75 {approx = true} : vector<8x1xf32> -> vector<8x1xf32>
    %77 = vector.broadcast %76 : vector<8x1xf32> to vector<8x8xf32>
    %78 = arith.mulf %73, %77 : vector<8x8xf32>
    %cst_46 = arith.constant dense<0.000000e+00> : vector<8x8xf32>
    %79 = tpu.matmul %78, %67, %cst_46 {dimension_numbers = #tpu.dot_dimension_numbers<[1], [0], [0], [1], [0, 0, 1, 1], [], []>} : vector<8x8xf32>, vector<8x8xf32>, vector<8x8xf32> -> vector<8x8xf32>
    %80 = tpu.concatenate %19, %39, %59, %79 in 1 : vector<8x8xf32>, vector<8x8xf32>, vector<8x8xf32>, vector<8x8xf32> -> vector<8x32xf32>
    %c0_47 = arith.constant 0 : index
    %c0_48 = arith.constant 0 : index
    %c0_49 = arith.constant 0 : index
    %81 = vector.load %arg3[%c0_47, %c0_48, %c0_49] : memref<1x8x32xf32, #tpu.memory_space<vmem>>, vector<1x8x32xf32>
    %82 = vector.shape_cast %81 : vector<1x8x32xf32> to vector<8x32xf32>
    %83 = vector.shape_cast %80 : vector<8x32xf32> to vector<1x8x32xf32>
    tpu.vector_store %arg3[%c0_47, %c0_48, %c0_49], %83 {strides = array<i32>} : memref<1x8x32xf32, #tpu.memory_space<vmem>>, vector<1x8x32xf32>,
    return
  }
  func.func @transform_0(%arg0: i32) -> (i32, i32, i32) {
    %c0_i32 = arith.constant 0 : i32
    %c0_i32_0 = arith.constant 0 : i32
    %c0_i32_1 = arith.constant 0 : i32
    return %arg0, %c0_i32, %c0_i32_0 : i32, i32, i32
  }
  func.func @transform_1(%arg0: i32) -> (i32, i32, i32) {
    %c0_i32 = arith.constant 0 : i32
    %c0_i32_0 = arith.constant 0 : i32
    %c0_i32_1 = arith.constant 0 : i32
    return %arg0, %c0_i32, %c0_i32_0 : i32, i32, i32
  }
  func.func @transform_2(%arg0: i32) -> (i32, i32, i32) {
    %c0_i32 = arith.constant 0 : i32
    %c0_i32_0 = arith.constant 0 : i32
    %c0_i32_1 = arith.constant 0 : i32
    return %arg0, %c0_i32, %c0_i32_0 : i32, i32, i32
  }
}

module attributes {stable_mosaic.version = 11 : i64} {
  func.func @_linear_kernel(%arg0: i32, %arg1: i32, %arg2: i32, %arg3: memref<16x32xf32, #tpu.memory_space<vmem>>, %arg4: memref<32x32xf32, #tpu.memory_space<vmem>>, %arg5: memref<1x32xf32, #tpu.memory_space<vmem>>, %arg6: memref<16x32xf32, #tpu.memory_space<vmem>>, %arg7: memref<16x32xf32, #tpu.memory_space<vmem>>) attributes {dimension_semantics = [#tpu.dimension_semantics<parallel>, #tpu.dimension_semantics<parallel>, #tpu.dimension_semantics<arbitrary>], iteration_bounds = array<i64: 1, 1, 1>, scalar_prefetch = 0 : i64, scratch_operands = 1 : i64, tpu.core_type = #tpu.core_type<tc>, window_params = [{transform_indices = @transform_0, window_bounds = array<i64: 16, 32>}, {transform_indices = @transform_1, window_bounds = array<i64: 32, 32>}, {transform_indices = @transform_2, window_bounds = array<i64: 1, 32>}, {transform_indices = @transform_3, window_bounds = array<i64: 16, 32>}]} {
    %c0 = arith.constant 0 : index
    %c0_0 = arith.constant 0 : index
    %0 = vector.load %arg3[%c0, %c0_0] : memref<16x32xf32, #tpu.memory_space<vmem>>, vector<16x32xf32>
    %c0_1 = arith.constant 0 : index
    %c0_2 = arith.constant 0 : index
    %1 = vector.load %arg4[%c0_1, %c0_2] : memref<32x32xf32, #tpu.memory_space<vmem>>, vector<32x32xf32>
    %cst = arith.constant dense<0.000000e+00> : vector<16x32xf32>
    %2 = tpu.matmul %0, %1, %cst {dimension_numbers = #tpu.dot_dimension_numbers<[1], [0], [0], [1], [0, 0, 1, 1], [], []>} : vector<16x32xf32>, vector<32x32xf32>, vector<16x32xf32> -> vector<16x32xf32>
    %c0_i32 = arith.constant 0 : i32
    %3 = arith.cmpi eq, %arg2, %c0_i32 : i32
    %4 = arith.extui %3 : i1 to i32
    %c0_i32_3 = arith.constant 0 : i32
    %5 = arith.cmpi ne, %4, %c0_i32_3 : i32
    scf.if %5 {
      %c0_8 = arith.constant 0 : index
      %c0_9 = arith.constant 0 : index
      %12 = vector.load %arg7[%c0_8, %c0_9] : memref<16x32xf32, #tpu.memory_space<vmem>>, vector<16x32xf32>
      tpu.vector_store %arg7[%c0_8, %c0_9], %2 {strides = array<i32>} : memref<16x32xf32, #tpu.memory_space<vmem>>, vector<16x32xf32>,
    } else {
    }
    %c0_i32_4 = arith.constant 0 : i32
    %6 = arith.cmpi sgt, %arg2, %c0_i32_4 : i32
    %7 = arith.extui %6 : i1 to i32
    %c0_i32_5 = arith.constant 0 : i32
    %8 = arith.cmpi ne, %7, %c0_i32_5 : i32
    scf.if %8 {
      %c0_8 = arith.constant 0 : index
      %c0_9 = arith.constant 0 : index
      %12 = vector.load %arg7[%c0_8, %c0_9] : memref<16x32xf32, #tpu.memory_space<vmem>>, vector<16x32xf32>
      %13 = arith.addf %12, %2 : vector<16x32xf32>
      %c0_10 = arith.constant 0 : index
      %c0_11 = arith.constant 0 : index
      %14 = vector.load %arg7[%c0_10, %c0_11] : memref<16x32xf32, #tpu.memory_space<vmem>>, vector<16x32xf32>
      tpu.vector_store %arg7[%c0_10, %c0_11], %13 {strides = array<i32>} : memref<16x32xf32, #tpu.memory_space<vmem>>, vector<16x32xf32>,
    } else {
    }
    %c0_i32_6 = arith.constant 0 : i32
    %9 = arith.cmpi eq, %arg2, %c0_i32_6 : i32
    %10 = arith.extui %9 : i1 to i32
    %c0_i32_7 = arith.constant 0 : i32
    %11 = arith.cmpi ne, %10, %c0_i32_7 : i32
    scf.if %11 {
      %c0_8 = arith.constant 0 : index
      %c0_9 = arith.constant 0 : index
      %12 = vector.load %arg7[%c0_8, %c0_9] : memref<16x32xf32, #tpu.memory_space<vmem>>, vector<16x32xf32>
      %c0_10 = arith.constant 0 : index
      %c0_11 = arith.constant 0 : index
      %13 = vector.load %arg5[%c0_10, %c0_11] : memref<1x32xf32, #tpu.memory_space<vmem>>, vector<1x32xf32>
      %14 = vector.broadcast %13 : vector<1x32xf32> to vector<16x32xf32>
      %15 = arith.addf %12, %14 : vector<16x32xf32>
      %c0_12 = arith.constant 0 : index
      %c0_13 = arith.constant 0 : index
      %16 = vector.load %arg6[%c0_12, %c0_13] : memref<16x32xf32, #tpu.memory_space<vmem>>, vector<16x32xf32>
      tpu.vector_store %arg6[%c0_12, %c0_13], %15 {strides = array<i32>} : memref<16x32xf32, #tpu.memory_space<vmem>>, vector<16x32xf32>,
    } else {
    }
    return
  }
  func.func @transform_0(%arg0: i32, %arg1: i32, %arg2: i32) -> (i32, i32) {
    %c0_i32 = arith.constant 0 : i32
    return %arg0, %arg2 : i32, i32
  }
  func.func @transform_1(%arg0: i32, %arg1: i32, %arg2: i32) -> (i32, i32) {
    %c0_i32 = arith.constant 0 : i32
    return %arg2, %arg1 : i32, i32
  }
  func.func @transform_2(%arg0: i32, %arg1: i32, %arg2: i32) -> (i32, i32) {
    %c0_i32 = arith.constant 0 : i32
    %c0_i32_0 = arith.constant 0 : i32
    return %c0_i32, %arg1 : i32, i32
  }
  func.func @transform_3(%arg0: i32, %arg1: i32, %arg2: i32) -> (i32, i32) {
    %c0_i32 = arith.constant 0 : i32
    return %arg0, %arg1 : i32, i32
  }
}

</mosaic_0001>

<bundles_post_ra>
// kernel: transformer_forward.25
= control target key start
LH: loop header
LB: loop body
LE: loop exit
PB: predicated region body
PF: predicated region fallthrough
CT: control target
= control target key end

     0   :  { %vm20_vm0 = vcmask 261120   ;;  %vm106_vm1 = vcmask 785408   ;;  %s210_s1 = inlined_call_operand.vmem [shape: f32[32,96], index: 1, kind: input, shape index: {}]   ;;  %s211_s0 = inlined_call_operand.vmem [shape: f32[16,32], index: 0, kind: input, shape index: {}]   ;;  %s212_s2 = inlined_call_operand.vmem [shape: f32[1,96], index: 2, kind: input, shape index: {}]   ;;  %s213_s3 = inlined_call_operand.vmem [shape: f32[16,96], index: 3, kind: output, shape index: {}]  }
   0x1   :  { %v19_v0 = vld [vmem:[%s210_s1 + $0x18] sm:$0xff]  ;;  %v18_v1 = vld [vmem:[%s210_s1 + $0x10] sm:$0xff]  ;;  %v14_v2 = vld [vmem:[%s211_s0] sm:$0xff] }
   0x2   :  { %150 = vmatprep.subr.mxu0 %v19_v0  ;;  %v17_v3 = vld [vmem:[%s210_s1 + $0x8] sm:$0xff]  ;;  %158 = vmatprep.mubr.msk.f32.mxu0 %vm20_vm0, %v14_v2  ;;  %v16_v4 = vld [vmem:[%s210_s1] sm:$0xff] }
   0x3   :  { %151 = vmatpush3.msra.mxu0 %v19_v0  ;;  %v15_v5 = vld [vmem:[%s211_s0 + $0x8] sm:$0xff]  ;;  %v143_v8 = vld [vmem:[%s212_s2] ss:$0 sm:$0xff] }
   0x4   :  { %152 = vmatprep.subr.mxu0 %v18_v1 }
   0x5   :  { %153 = vmatpush3.msra.mxu0 %v18_v1 }
   0x6   :  { %154 = vmatprep.subr.mxu0 %v17_v3 }
   0x7   :  { %155 = vmatpush3.msra.mxu0 %v17_v3 }
   0x8   :  { %156 = vmatprep.subr.mxu0 %v16_v4 }
   0x9   :  { %157 = vmatpush3.msra.mxu0 %v16_v4 }
   0xa   :  { %159 = vmatmul.mubr.msk.f32.vlgmr.msra.gmra.mxu0 %vm20_vm0, %v15_v5 }
  0xca   :  { %v160_v6 = vpop.f32.mrf.mxu0 }
  0xcb   :  { %108 = vst.msk [vmem:[#allocation2 + $0x8] sm:$0xff] %vm106_vm1, %v160_v6 }
  0xcc   :  { %v93_v7 = vpop.f32.mrf.mxu0 }
  0xcd   :  { %107 = vst.msk [vmem:[#allocation2] sm:$0xff] %vm106_vm1, %v93_v7 }
  0xd2   :  { %v124_v9 = vld [vmem:[#allocation2 + $0x8] sm:$0xff] }
  0xd3   :  { %v133_v10 = vadd.f32 %v143_v8, %v124_v9 }
  0xd4   :  { %v123_v11 = vld [vmem:[#allocation2] sm:$0xff] }
  0xd5   :  { %136 = vst.msk [vmem:[%s213_s3 + $0x8] sm:$0xff] %vm106_vm1, %v133_v10  ;;  %v132_v12 = vadd.f32 %v143_v8, %v123_v11 }
  0xd7   :  { %135 = vst.msk [vmem:[%s213_s3] sm:$0xff] %vm106_vm1, %v132_v12 }

// kernel: transformer_forward.27
= control target key start
LH: loop header
LB: loop body
LE: loop exit
PB: predicated region body
PF: predicated region fallthrough
CT: control target
= control target key end

     0   :  { %vm29_vm0 = vcmask 261120   ;;  %s306_s1 = inlined_call_operand.vmem [shape: f32[32,32], index: 1, kind: input, shape index: {}]   ;;  %s307_s0 = inlined_call_operand.vmem [shape: f32[16,32], index: 0, kind: input, shape index: {}]   ;;  %s308_s2 = inlined_call_operand.vmem [shape: f32[1,32], index: 2, kind: input, shape index: {}]   ;;  %s309_s3 = inlined_call_operand.vmem [shape: f32[16,32], index: 3, kind: input, shape index: {}]   ;;  %s310_s4 = inlined_call_operand.vmem [shape: f32[1,32], index: 4, kind: input, shape index: {}]   ;;  %s311_s5 = inlined_call_operand.vmem [shape: f32[1,32], index: 5, kind: input, shape index: {}]   ;;  %s312_s6 = inlined_call_operand.vmem [shape: f32[16,32], index: 6, kind: output, shape index: {}]  }
   0x1   :  { %v28_v0 = vld [vmem:[%s306_s1 + $0x18] sm:$0xff]  ;;  %v27_v1 = vld [vmem:[%s306_s1 + $0x10] sm:$0xff]  ;;  %v23_v2 = vld [vmem:[%s307_s0] sm:$0xff] }
   0x2   :  { %207 = vmatprep.subr.mxu0 %v28_v0  ;;  %v26_v3 = vld [vmem:[%s306_s1 + $0x8] sm:$0xff]  ;;  %215 = vmatprep.mubr.msk.f32.mxu0 %vm29_vm0, %v23_v2  ;;  %v25_v4 = vld [vmem:[%s306_s1] sm:$0xff] }
   0x3   :  { %208 = vmatpush3.msra.mxu0 %v28_v0  ;;  %v24_v5 = vld [vmem:[%s307_s0 + $0x8] sm:$0xff]  ;;  %v198_v8 = vld [vmem:[%s308_s2] ss:$0 sm:$0xff] }
   0x4   :  { %209 = vmatprep.subr.mxu0 %v27_v1  ;;  %v141_v11 = vld [vmem:[%s309_s3] sm:$0xff]  ;;  %v142_v14 = vld [vmem:[%s309_s3 + $0x8] sm:$0xff] }
   0x5   :  { %210 = vmatpush3.msra.mxu0 %v27_v1  ;;  %v199_v36 = vld [vmem:[%s310_s4] ss:$0 sm:$0xff] }
   0x6   :  { %211 = vmatprep.subr.mxu0 %v26_v3  ;;  %v200_v38 = vld [vmem:[%s311_s5] ss:$0 sm:$0xff] }
   0x7   :  { %212 = vmatpush3.msra.mxu0 %v26_v3 }
   0x8   :  { %213 = vmatprep.subr.mxu0 %v25_v4 }
   0x9   :  { %214 = vmatpush3.msra.mxu0 %v25_v4 }
   0xa   :  { %216 = vmatmul.mubr.msk.f32.vlgmr.msra.gmra.mxu0 %vm29_vm0, %v24_v5 }
  0xca   :  { %v217_v6 = vpop.f32.mrf.mxu0 }
  0xcb   :  { %116 = vst.msk [vmem:[#allocation2 + $0x8] sm:$0xff] %vm29_vm0, %v217_v6 }
  0xcc   :  { %v102_v7 = vpop.f32.mrf.mxu0 }
  0xcd   :  { %115 = vst.msk [vmem:[#allocation2] sm:$0xff] %vm29_vm0, %v102_v7 }
  0xd2   :  { %v131_v9 = vld [vmem:[#allocation2 + $0x8] sm:$0xff] }
  0xd3   :  { %v140_v13 = vadd.f32 %v198_v8, %v131_v9 }
  0xd4   :  { %v130_v10 = vld [vmem:[#allocation2] sm:$0xff] }
  0xd5   :  { %v139_v12 = vadd.f32 %v198_v8, %v130_v10  ;;  %v144_v17 = vadd.f32 %v142_v14, %v140_v13 }
  0xd7   :  { %v143_v15 = vadd.f32 %v141_v11, %v139_v12  ;;  %v148_v18 = vsel %vm29_vm0, %v144_v17, 0.0 }
  0xd9   :  { %v145_v16 = vsel %vm29_vm0, %v143_v15, 0.0 }
  0xda   :  { %146 = vadd.xlane.f32.xlu0 %v145_v16 }
  0xde   :  { %149 = vadd.xlane.f32.xlu0 %v148_v18 }
 0x163   :  { %v147_v19 = vpop.xlane.xlu0 %146 }
 0x164   :  { %v152_v20 = vmul.f32 0.03125, %v147_v19 }
 0x166   :  { %v154_v21 = vsub.f32 %v143_v15, %v152_v20 }
 0x167   :  { %v150_v22 = vpop.xlane.xlu0 %149 }
 0x168   :  { %v153_v23 = vmul.f32 0.03125, %v150_v22  ;;  %v156_v24 = vmul.f32 %v154_v21, %v154_v21 }
 0x16a   :  { %v155_v25 = vsub.f32 %v144_v17, %v153_v23  ;;  %v158_v26 = vsel %vm29_vm0, %v156_v24, 0.0 }
 0x16b   :  { %159 = vadd.xlane.f32.xlu1 %v158_v26 }
 0x16c   :  { %v157_v27 = vmul.f32 %v155_v25, %v155_v25 }
 0x16e   :  { %v161_v28 = vsel %vm29_vm0, %v157_v27, 0.0 }
 0x16f   :  { %162 = vadd.xlane.f32.xlu1 %v161_v28 }
 0x1f4   :  { %v160_v29 = vpop.xlane.xlu1 %159 }
 0x1f5   :  { %v164_v30 = vmul.f32 0.03125, %v160_v29 }
 0x1f7   :  { %v166_v31 = vadd.f32 1e-05, %v164_v30 }
 0x1f8   :  { %v163_v32 = vpop.xlane.xlu1 %162 }
 0x1f9   :  { %218 = vrsqrt.f32 %v166_v31  ;;  %v165_v33 = vmul.f32 0.03125, %v163_v32 }
 0x1fb   :  { %v167_v34 = vadd.f32 1e-05, %v165_v33 }
 0x1fd   :  { %220 = vrsqrt.f32 %v167_v34 }
 0x206   :  { %v219_v35 = vpop.eup %218 }
 0x207   :  { %v170_v37 = vmul.f32 %v219_v35, %v154_v21 }
 0x209   :  { %v179_v39 = vmul.f32 %v199_v36, %v170_v37 }
 0x20a   :  { %v221_v40 = vpop.eup %220 }
 0x20b   :  { %v188_v41 = vadd.f32 %v200_v38, %v179_v39  ;;  %v171_v42 = vmul.f32 %v221_v40, %v155_v25 }
 0x20d   :  { %190 = vst.msk [vmem:[%s312_s6] sm:$0xff] %vm29_vm0, %v188_v41  ;;  %v180_v43 = vmul.f32 %v199_v36, %v171_v42 }
 0x20f   :  { %v189_v44 = vadd.f32 %v200_v38, %v180_v43 }
 0x211   :  { %191 = vst.msk [vmem:[%s312_s6 + $0x8] sm:$0xff] %vm29_vm0, %v189_v44 }

// kernel: transformer_forward.26
= control target key start
LH: loop header
LB: loop body
LE: loop exit
PB: predicated region body
PF: predicated region fallthrough
CT: control target
= control target key end

     0   :  { %s998_s6 = smov 0   ;;  %s1081_s0 = inlined_call_operand.vmem [shape: f32[2,8,96], index: 0, kind: input, shape index: {}]   ;;  %s1082_s1 = inlined_call_operand.vmem [shape: f32[2,8,32], index: 1, kind: output, shape index: {}]  }
   0x1 LB: > { %s847_s7 = sadd.s32 4294967295, %s970_s6   ;;  %p851_p0 = scmp.ge.s32.totalorder %s970_s6, 1  ;;  %s970_s6 = sphi %s998_s6, %s11_s6  }
   0x2   : > { %p86_p1 = scmp.lt.s32.totalorder %s970_s6, 3 }
   0x4   : > { %p87_p2 = pnand %p851_p0, %p86_p1 }
   0x5   : > { %p104_p3 = scmp.lt.s32.totalorder (!%p87_p2), %s847_s7, 1  ;;  %s974_s12 = smov (!%p87_p2), 96  }
   0x6   : > { %90 = sbr.rel (%p87_p2) target bundleno = 1465 (0x5b9), region = 24  ;;  %s975_s13 = smov (!%p87_p2), 64  }
   0x7   : > { %s976_s14 = smov (!%p87_p2), 88   ;;  %s977_s15 = smov (!%p87_p2), 120  }
   0x8   : > { %s978_s16 = smov (!%p87_p2), 80   ;;  %s979_s17 = smov (!%p87_p2), 72  }
   0x9   : > { %s980_s18 = smov (!%p87_p2), 112   ;;  %s981_s19 = smov (!%p87_p2), 104  }
   0xa   : > { %s982_s20 = smov (!%p87_p2), 56   ;;  %s983_s21 = smov (!%p87_p2), 40  }
   0xb   : > { %v972_v0 = vmov 0.0   ;;  %vm973_vm0 = vmmov 0   ;;  %s1084_s7 = smov (!%p104_p3, %s847_s7), 1  ;;  %vm117_vm1 = vcmask 64512   ;;  %s984_s22 = smov 48   ;;  %vm788_vm2 = vcmask 130048  }
   0xc   : > { %884 = vmatprep.subr.mxu0 %v972_v0  ;;  %886 = vmatprep.mubr.msk.f32.mxu0 %vm973_vm0, %v972_v0  ;;  %s852_s8 = sshll.u32 %s1084_s7, 3  ;;  %s985_s23 = smov 8   ;;  %vm790_vm3 = vcmask 195584   ;;  %vm792_vm4 = vcmask 261120  }
   0xd   : > { %889 = vmatprep.subr.mxu1 %v972_v0  ;;  %891 = vmatprep.mubr.msk.f32.mxu1 %vm973_vm0, %v972_v0  ;;  %s107_s11 = scalar_lea.vmem %s1081_s0, %s852_s8  ;;  %s986_s24 = smov 16  }
   0xe   : > { %v1020_v1 = vld [vmem:[%s107_s11] sm:$0xff]  ;;  %s987_s25 = smov 24   ;;  %s111_s28 = scalar_lea.vmem %s1082_s1, %s852_s8 }
   0xf   : > { %115 = vrot.lane.b32.xlu0 %v1020_v1, %s974_s12  ;;  %v113_v3 = vmul.f32 0.35355338, %v1020_v1  ;;  %204 = vrot.lane.b32.xlu1 %v1020_v1, %s975_s13 }
  0x13   : > { %282 = vrot.lane.b32.xlu1 %v1020_v1, %s976_s14 }
  0x17   : > { %280 = vrot.lane.b32.xlu1 %v113_v3, %s977_s15 }
  0x1b   : > { %447 = vrot.lane.b32.xlu1 %v1020_v1, %s978_s16 }
  0x81   : > { %v116_v2 = vpop.permute.xlu0 %115  ;;  %v205_v7 = vpop.permute.xlu1 %204 }
  0x82   : > { %885 = vmatpush3.xpose.msk.msra.mxu0 %vm117_vm1, %v116_v2  ;;  %890 = vmatpush3.msra.mxu1 %v205_v7 }
  0x83   : > { %899 = vmatprep.subr.mxu0 %v972_v0  ;;  %894 = vmatprep.subr.mxu1 %v972_v0 }
  0x85   : > { %887 = vmatmul.mubr.msk.f32.vlgmr.msra.gmra.mxu0 %vm117_vm1, %v113_v3  ;;  %v283_v13 = vpop.permute.xlu1 %282 }
  0x86   : > { %901 = vmatprep.mubr.msk.f32.mxu0 %vm973_vm0, %v972_v0 }
  0x89   : > { %v281_v14 = vpop.permute.xlu1 %280 }
  0x8d   : > { %v448_v15 = vpop.permute.xlu1 %447 }
 0x145   : > { %v189_v4 = vpop.f32.mrf.mxu0 }
 0x146   : > { %v193_v5 = vsel %vm117_vm1, %v189_v4, -inf }
 0x147   : > { %194 = vmax.xlane.f32.xlu0 %v193_v5  ;;  %v888_v6 = vpop.f32.mrf.mxu0 }
 0x15d   : > { %612 = vrot.lane.b32.xlu0 %v1020_v1, %s979_s17 }
 0x1d0   : > { %v195_v8 = vpop.xlane.xlu0 %194 }
 0x1d1   : > { %v196_v9 = vsub.f32 %v189_v4, %v195_v8 }
 0x1d3   : > { %v197_v10 = vmul.f32 1.442695, %v196_v9 }
 0x1d4   : > { %v613_v20 = vpop.permute.xlu0 %612 }
 0x1d5   : > { %948 = vpow2.f32 %v197_v10 }
 0x1e2   : > { %v949_v11 = vpop.eup %948 }
 0x1e3   : > { %v199_v12 = vsel %vm117_vm1, %v949_v11, 0.0 }
 0x1e4   : > { %200 = vadd.xlane.f32.xlu1 %v199_v12 }
 0x1f5   : > { %445 = vrot.lane.b32.xlu1 %v113_v3, %s980_s18 }
 0x1f9   : > { %610 = vrot.lane.b32.xlu1 %v113_v3, %s981_s19 }
 0x26d   : > { %v201_v16 = vpop.xlane.xlu1 %200 }
 0x26e   : > { %950 = vrcp.f32 %v201_v16 }
 0x271   : > { %v446_v19 = vpop.permute.xlu1 %445 }
 0x275   : > { %v611_v21 = vpop.permute.xlu1 %610 }
 0x27b   : > { %v951_v17 = vpop.eup %950 }
 0x27c   : > { %v203_v18 = vmul.f32 %v951_v17, %v949_v11 }
 0x27e   : > { %892 = vmatmul.mubr.msk.f32.vlgmr.msra.gmra.mxu1 %vm117_vm1, %v203_v18 }
 0x27f   : > { %895 = vmatpush3.xpose.msk.msra.mxu1 %vm117_vm1, %v283_v13  ;;  %896 = vmatprep.mubr.msk.f32.mxu1 %vm973_vm0, %v972_v0 }
 0x280   : > { %904 = vmatprep.subr.mxu1 %v972_v0 }
 0x282   : > { %897 = vmatmul.mubr.msk.f32.vlgmr.msra.gmra.mxu1 %vm117_vm1, %v281_v14 }
 0x283   : > { %905 = vmatpush3.xpose.msk.msra.mxu1 %vm117_vm1, %v448_v15  ;;  %906 = vmatprep.mubr.msk.f32.mxu1 %vm973_vm0, %v972_v0 }
 0x284   : > { %914 = vmatprep.subr.mxu1 %v972_v0 }
 0x286   : > { %907 = vmatmul.mubr.msk.f32.vlgmr.msra.gmra.mxu1 %vm117_vm1, %v446_v19 }
 0x287   : > { %915 = vmatpush3.xpose.msk.msra.mxu1 %vm117_vm1, %v613_v20  ;;  %916 = vmatprep.mubr.msk.f32.mxu1 %vm973_vm0, %v972_v0 }
 0x28a   : > { %917 = vmatmul.mubr.msk.f32.vlgmr.msra.gmra.mxu1 %vm117_vm1, %v611_v21 }
 0x33e   : > { %v1051_v22 = vpop.f32.mrf.mxu1 }
 0x340   : > { %v893_v23 = vpop.f32.mrf.mxu1 }
 0x342   : > { %v354_v24 = vpop.f32.mrf.mxu1 }
 0x343   : > { %v358_v25 = vsel %vm117_vm1, %v354_v24, -inf }
 0x344   : > { %359 = vmax.xlane.f32.xlu1 %v358_v25  ;;  %v898_v26 = vpop.f32.mrf.mxu1 }
 0x346   : > { %v519_v27 = vpop.f32.mrf.mxu1 }
 0x347   : > { %v523_v28 = vsel %vm117_vm1, %v519_v27, -inf }
 0x348   : > { %524 = vmax.xlane.f32.xlu0 %v523_v28  ;;  %v908_v29 = vpop.f32.mrf.mxu1 }
 0x34a   : > { %v684_v30 = vpop.f32.mrf.mxu1 }
 0x34b   : > { %v688_v31 = vsel %vm117_vm1, %v684_v30, -inf }
 0x34c   : > { %689 = vmax.xlane.f32.xlu1 %v688_v31  ;;  %v918_v32 = vpop.f32.mrf.mxu1 }
 0x35d   : > { %369 = vrot.lane.b32.xlu1 %v1020_v1, %s982_s20 }
 0x3cd   : > { %v360_v33 = vpop.xlane.xlu1 %359 }
 0x3ce   : > { %v361_v34 = vsub.f32 %v354_v24, %v360_v33 }
 0x3d0   : > { %v362_v35 = vmul.f32 1.442695, %v361_v34 }
 0x3d1   : > { %v525_v36 = vpop.xlane.xlu0 %524 }
 0x3d2   : > { %952 = vpow2.f32 %v362_v35  ;;  %v526_v37 = vsub.f32 %v519_v27, %v525_v36 }
 0x3d4   : > { %v527_v38 = vmul.f32 1.442695, %v526_v37 }
 0x3d5   : > { %v690_v39 = vpop.xlane.xlu1 %689 }
 0x3d6   : > { %954 = vpow2.f32 %v527_v38  ;;  %v691_v40 = vsub.f32 %v684_v30, %v690_v39 }
 0x3d8   : > { %v692_v41 = vmul.f32 1.442695, %v691_v40 }
 0x3d9   : > { %v370_v42 = vpop.permute.xlu1 %369 }
 0x3da   : > { %956 = vpow2.f32 %v692_v41  ;;  %900 = vmatpush3.msra.mxu0 %v370_v42 }
 0x3db   : > { %909 = vmatprep.subr.mxu0 %v972_v0 }
 0x3df   : > { %v953_v43 = vpop.eup %952 }
 0x3e0   : > { %v364_v44 = vsel %vm117_vm1, %v953_v43, 0.0 }
 0x3e1   : > { %365 = vadd.xlane.f32.xlu1 %v364_v44 }
 0x3e3   : > { %v955_v45 = vpop.eup %954 }
 0x3e4   : > { %v529_v46 = vsel %vm117_vm1, %v955_v45, 0.0 }
 0x3e5   : > { %530 = vadd.xlane.f32.xlu1 %v529_v46 }
 0x3e7   : > { %v957_v47 = vpop.eup %956 }
 0x3e8   : > { %v694_v48 = vsel %vm117_vm1, %v957_v47, 0.0 }
 0x3e9   : > { %695 = vadd.xlane.f32.xlu0 %v694_v48 }
 0x3f6   : > { %699 = vrot.lane.b32.xlu1 %v1020_v1, %s983_s21 }
 0x3ff   : > { %534 = vrot.lane.b32.xlu0 %v1020_v1, %s984_s22 }
 0x46a   : > { %v366_v49 = vpop.xlane.xlu1 %365 }
 0x46b   : > { %958 = vrcp.f32 %v366_v49 }
 0x46e   : > { %v531_v50 = vpop.xlane.xlu1 %530 }
 0x46f   : > { %960 = vrcp.f32 %v531_v50 }
 0x472   : > { %v696_v51 = vpop.xlane.xlu0 %695  ;;  %v700_v56 = vpop.permute.xlu1 %699 }
 0x473   : > { %962 = vrcp.f32 %v696_v51 }
 0x476   : > { %v535_v53 = vpop.permute.xlu0 %534 }
 0x478   : > { %v959_v52 = vpop.eup %958 }
 0x479   : > { %v368_v54 = vmul.f32 %v959_v52, %v953_v43 }
 0x47b   : > { %902 = vmatmul.mubr.msk.f32.vlgmr.msra.gmra.mxu0 %vm117_vm1, %v368_v54 }
 0x47c   : > { %v961_v55 = vpop.eup %960  ;;  %910 = vmatpush3.msra.mxu0 %v535_v53  ;;  %911 = vmatprep.mubr.msk.f32.mxu0 %vm973_vm0, %v972_v0 }
 0x47d   : > { %919 = vmatprep.subr.mxu0 %v972_v0  ;;  %v533_v57 = vmul.f32 %v961_v55, %v955_v45 }
 0x47f   : > { %912 = vmatmul.mubr.msk.f32.vlgmr.msra.gmra.mxu0 %vm117_vm1, %v533_v57 }
 0x480   : > { %v963_v58 = vpop.eup %962  ;;  %920 = vmatpush3.msra.mxu0 %v700_v56  ;;  %921 = vmatprep.mubr.msk.f32.mxu0 %vm973_vm0, %v972_v0 }
 0x481   : > { %v698_v59 = vmul.f32 %v963_v58, %v957_v47 }
 0x483   : > { %922 = vmatmul.mubr.msk.f32.vlgmr.msra.gmra.mxu0 %vm117_vm1, %v698_v59 }
 0x53b   : > { %v441_v60 = vpop.f32.mrf.mxu0 }
 0x53c   : > { %776 = vrot.lane.b32.xlu1 %v441_v60, %s985_s23 }
 0x53d   : > { %v903_v61 = vpop.f32.mrf.mxu0 }
 0x53f   : > { %v606_v62 = vpop.f32.mrf.mxu0 }
 0x540   : > { %780 = vrot.lane.b32.xlu0 %v606_v62, %s986_s24 }
 0x541   : > { %v913_v63 = vpop.f32.mrf.mxu0 }
 0x543   : > { %v771_v1 = vpop.f32.mrf.mxu0 }
 0x544   : > { %784 = vrot.lane.b32.xlu1 %v771_v1, %s987_s25 }
 0x545   : > { %v923_v2 = vpop.f32.mrf.mxu0 }
 0x5ae   : > { %v777_v3 = vpop.permute.xlu1 %776 }
 0x5af   : > { %v787_v0 = vsel %vm117_vm1, %v1051_v22, %v777_v3 }
 0x5b2   : > { %v781_v4 = vpop.permute.xlu0 %780 }
 0x5b3   : > { %v789_v5 = vsel %vm788_vm2, %v787_v0, %v781_v4 }
 0x5b6   : > { %v785_v6 = vpop.permute.xlu1 %784 }
 0x5b7   : > { %v791_v7 = vsel %vm790_vm3, %v789_v5, %v785_v6 }
 0x5b8   : > { %793 = vst.msk [vmem:[%s111_s28] sm:$0xff] %vm792_vm4, %v791_v7 }
 0x5b9 PF: > { %s11_s6 = sadd.s32 1, %s970_s6  }
 0x5ba   : > { %p8_p4 = scmp.ge.s32.totalorder %s11_s6, 4  }
 0x5bc   :  { %10 = sbr.rel (!%p8_p4) target bundleno = 1 (0x1), region = 54 }

// kernel: transformer_forward.28
= control target key start
LH: loop header
LB: loop body
LE: loop exit
PB: predicated region body
PF: predicated region fallthrough
CT: control target
= control target key end

     0   :  { %vm39_vm0 = vcmask 261120   ;;  %vm131_vm1 = vcmask 523264   ;;  %s464_s1 = inlined_call_operand.vmem [shape: f32[32,64], index: 1, kind: input, shape index: {}]   ;;  %s465_s0 = inlined_call_operand.vmem [shape: f32[16,32], index: 0, kind: input, shape index: {}]   ;;  %s466_s3 = inlined_call_operand.vmem [shape: f32[64,32], index: 3, kind: input, shape index: {}]   ;;  %s467_s2 = inlined_call_operand.vmem [shape: f32[1,64], index: 2, kind: input, shape index: {}]   ;;  %s468_s4 = inlined_call_operand.vmem [shape: f32[1,32], index: 4, kind: input, shape index: {}]   ;;  %s469_s5 = inlined_call_operand.vmem [shape: f32[1,32], index: 5, kind: input, shape index: {}]   ;;  %s470_s6 = inlined_call_operand.vmem [shape: f32[1,32], index: 6, kind: input, shape index: {}]   ;;  %s471_s7 = inlined_call_operand.vmem [shape: f32[16,32], index: 7, kind: output, shape index: {}]  }
   0x1   :  { %v31_v0 = vld [vmem:[%s464_s1 + $0x18] sm:$0xff]  ;;  %v30_v1 = vld [vmem:[%s464_s1 + $0x10] sm:$0xff]  ;;  %v26_v2 = vld [vmem:[%s465_s0] sm:$0xff] }
   0x2   :  { %320 = vmatprep.subr.mxu0 %v31_v0  ;;  %v29_v3 = vld [vmem:[%s464_s1 + $0x8] sm:$0xff]  ;;  %328 = vmatprep.mubr.msk.f32.mxu0 %vm39_vm0, %v26_v2  ;;  %v130_v4 = vld [vmem:[%s466_s3 + $0x38] sm:$0xff]  ;;  %v129_v5 = vld [vmem:[%s466_s3 + $0x30] sm:$0xff] }
   0x3   :  { %321 = vmatpush3.msra.mxu0 %v31_v0  ;;  %331 = vmatprep.subr.mxu1 %v130_v4  ;;  %v28_v6 = vld [vmem:[%s464_s1] sm:$0xff]  ;;  %v128_v7 = vld [vmem:[%s466_s3 + $0x28] sm:$0xff]  ;;  %v126_v10 = vld [vmem:[%s466_s3 + $0x18] sm:$0xff] }
   0x4   :  { %322 = vmatprep.subr.mxu0 %v30_v1  ;;  %332 = vmatpush3.msra.mxu1 %v130_v4  ;;  %v27_v8 = vld [vmem:[%s465_s0 + $0x8] sm:$0xff]  ;;  %v127_v9 = vld [vmem:[%s466_s3 + $0x20] sm:$0xff]  ;;  %v125_v11 = vld [vmem:[%s466_s3 + $0x10] sm:$0xff] }
   0x5   :  { %323 = vmatpush3.msra.mxu0 %v30_v1  ;;  %333 = vmatprep.subr.mxu1 %v129_v5  ;;  %v124_v12 = vld [vmem:[%s466_s3 + $0x8] sm:$0xff]  ;;  %v123_v13 = vld [vmem:[%s466_s3] sm:$0xff] }
   0x6   :  { %324 = vmatprep.subr.mxu0 %v29_v3  ;;  %334 = vmatpush3.msra.mxu1 %v129_v5  ;;  %v296_v14 = vld [vmem:[%s467_s2] ss:$0 sm:$0xff] }
   0x7   :  { %325 = vmatpush3.msra.mxu0 %v29_v3  ;;  %335 = vmatprep.subr.mxu1 %v128_v7  ;;  %v301_v23 = vld [vmem:[%s468_s4] ss:$0 sm:$0xff] }
   0x8   :  { %326 = vmatprep.subr.mxu0 %v28_v6  ;;  %336 = vmatpush3.msra.mxu1 %v128_v7  ;;  %v302_v49 = vld [vmem:[%s469_s5] ss:$0 sm:$0xff] }
   0x9   :  { %327 = vmatpush3.msra.mxu0 %v28_v6  ;;  %337 = vmatprep.subr.mxu1 %v127_v9  ;;  %v303_v51 = vld [vmem:[%s470_s6] ss:$0 sm:$0xff] }
   0xa   :  { %329 = vmatmul.mubr.msk.f32.vlgmr.msra.gmra.mxu0 %vm39_vm0, %v27_v8  ;;  %338 = vmatpush3.msra.mxu1 %v127_v9 }
   0xb   :  { %339 = vmatprep.subr.mxu1 %v126_v10 }
   0xc   :  { %340 = vmatpush3.msra.mxu1 %v126_v10 }
   0xd   :  { %341 = vmatprep.subr.mxu1 %v125_v11 }
   0xe   :  { %342 = vmatpush3.msra.mxu1 %v125_v11 }
   0xf   :  { %343 = vmatprep.subr.mxu1 %v124_v12 }
  0x10   :  { %344 = vmatpush3.msra.mxu1 %v124_v12 }
  0x11   :  { %345 = vmatprep.subr.mxu1 %v123_v13 }
  0x12   :  { %346 = vmatpush3.msra.mxu1 %v123_v13 }
  0xca   :  { %v330_v15 = vpop.f32.mrf.mxu0 }
  0xcb   :  { %v118_v16 = vadd.f32 %v330_v15, %v296_v14 }
  0xcc   :  { %v112_v17 = vpop.f32.mrf.mxu0 }
  0xcd   :  { %v113_v18 = vadd.f32 %v296_v14, %v112_v17  ;;  %v122_v20 = vmax.f32 %v118_v16, 0.0 }
  0xcf   :  { %v121_v19 = vmax.f32 %v113_v18, 0.0 }
  0xd1   :  { %347 = vmatprep.mubr.msk.f32.mxu1 %vm131_vm1, %v121_v19 }
  0xd2   :  { %348 = vmatmul.mubr.msk.f32.vlgmr.msra.gmra.mxu1 %vm131_vm1, %v122_v20 }
 0x192   :  { %v349_v21 = vpop.f32.mrf.mxu1 }
 0x193   :  { %218 = vst.msk [vmem:[#allocation2 + $0x8] sm:$0xff] %vm39_vm0, %v349_v21 }
 0x194   :  { %v204_v22 = vpop.f32.mrf.mxu1 }
 0x195   :  { %217 = vst.msk [vmem:[#allocation2] sm:$0xff] %vm39_vm0, %v204_v22 }
 0x19a   :  { %v233_v24 = vld [vmem:[#allocation2 + $0x8] sm:$0xff] }
 0x19b   :  { %v242_v27 = vadd.f32 %v301_v23, %v233_v24 }
 0x19c   :  { %v232_v25 = vld [vmem:[#allocation2] sm:$0xff] }
 0x19d   :  { %v241_v26 = vadd.f32 %v301_v23, %v232_v25  ;;  %v244_v30 = vadd.f32 %v242_v27, %v27_v8 }
 0x19f   :  { %v243_v28 = vadd.f32 %v241_v26, %v26_v2  ;;  %v248_v31 = vsel %vm39_vm0, %v244_v30, 0.0 }
 0x1a1   :  { %v245_v29 = vsel %vm39_vm0, %v243_v28, 0.0 }
 0x1a2   :  { %246 = vadd.xlane.f32.xlu0 %v245_v29 }
 0x1a6   :  { %249 = vadd.xlane.f32.xlu0 %v248_v31 }
 0x22b   :  { %v247_v32 = vpop.xlane.xlu0 %246 }
 0x22c   :  { %v252_v33 = vmul.f32 0.03125, %v247_v32 }
 0x22e   :  { %v254_v34 = vsub.f32 %v243_v28, %v252_v33 }
 0x22f   :  { %v250_v35 = vpop.xlane.xlu0 %249 }
 0x230   :  { %v253_v36 = vmul.f32 0.03125, %v250_v35  ;;  %v256_v37 = vmul.f32 %v254_v34, %v254_v34 }
 0x232   :  { %v255_v38 = vsub.f32 %v244_v30, %v253_v36  ;;  %v258_v39 = vsel %vm39_vm0, %v256_v37, 0.0 }
 0x233   :  { %259 = vadd.xlane.f32.xlu1 %v258_v39 }
 0x234   :  { %v257_v40 = vmul.f32 %v255_v38, %v255_v38 }
 0x236   :  { %v261_v41 = vsel %vm39_vm0, %v257_v40, 0.0 }
 0x237   :  { %262 = vadd.xlane.f32.xlu1 %v261_v41 }
 0x2bc   :  { %v260_v42 = vpop.xlane.xlu1 %259 }
 0x2bd   :  { %v264_v43 = vmul.f32 0.03125, %v260_v42 }
 0x2bf   :  { %v266_v44 = vadd.f32 1e-05, %v264_v43 }
 0x2c0   :  { %v263_v45 = vpop.xlane.xlu1 %262 }
 0x2c1   :  { %350 = vrsqrt.f32 %v266_v44  ;;  %v265_v46 = vmul.f32 0.03125, %v263_v45 }
 0x2c3   :  { %v267_v47 = vadd.f32 1e-05, %v265_v46 }
 0x2c5   :  { %352 = vrsqrt.f32 %v267_v47 }
 0x2ce   :  { %v351_v48 = vpop.eup %350 }
 0x2cf   :  { %v270_v50 = vmul.f32 %v351_v48, %v254_v34 }
 0x2d1   :  { %v279_v52 = vmul.f32 %v302_v49, %v270_v50 }
 0x2d2   :  { %v353_v53 = vpop.eup %352 }
 0x2d3   :  { %v288_v54 = vadd.f32 %v303_v51, %v279_v52  ;;  %v271_v55 = vmul.f32 %v353_v53, %v255_v38 }
 0x2d5   :  { %290 = vst.msk [vmem:[%s471_s7] sm:$0xff] %vm39_vm0, %v288_v54  ;;  %v280_v56 = vmul.f32 %v302_v49, %v271_v55 }
 0x2d7   :  { %v289_v57 = vadd.f32 %v303_v51, %v280_v56 }
 0x2d9   :  { %291 = vst.msk [vmem:[%s471_s7 + $0x8] sm:$0xff] %vm39_vm0, %v289_v57 }

// kernel: transformer_forward.37
= control target key start
LH: loop header
LB: loop body
LE: loop exit
PB: predicated region body
PF: predicated region fallthrough
CT: control target
= control target key end

     0   :  { %vm20_vm0 = vcmask 261120   ;;  %vm106_vm1 = vcmask 523264   ;;  %s210_s1 = inlined_call_operand.vmem [shape: f32[32,64], index: 1, kind: input, shape index: {}]   ;;  %s211_s0 = inlined_call_operand.vmem [shape: f32[16,32], index: 0, kind: input, shape index: {}]   ;;  %s212_s2 = inlined_call_operand.vmem [shape: f32[1,64], index: 2, kind: input, shape index: {}]   ;;  %s213_s3 = inlined_call_operand.vmem [shape: f32[16,64], index: 3, kind: output, shape index: {}]  }
   0x1   :  { %v19_v0 = vld [vmem:[%s210_s1 + $0x18] sm:$0xff]  ;;  %v18_v1 = vld [vmem:[%s210_s1 + $0x10] sm:$0xff]  ;;  %v14_v2 = vld [vmem:[%s211_s0] sm:$0xff] }
   0x2   :  { %150 = vmatprep.subr.mxu0 %v19_v0  ;;  %v17_v3 = vld [vmem:[%s210_s1 + $0x8] sm:$0xff]  ;;  %158 = vmatprep.mubr.msk.f32.mxu0 %vm20_vm0, %v14_v2  ;;  %v16_v4 = vld [vmem:[%s210_s1] sm:$0xff] }
   0x3   :  { %151 = vmatpush3.msra.mxu0 %v19_v0  ;;  %v15_v5 = vld [vmem:[%s211_s0 + $0x8] sm:$0xff]  ;;  %v143_v8 = vld [vmem:[%s212_s2] ss:$0 sm:$0xff] }
   0x4   :  { %152 = vmatprep.subr.mxu0 %v18_v1 }
   0x5   :  { %153 = vmatpush3.msra.mxu0 %v18_v1 }
   0x6   :  { %154 = vmatprep.subr.mxu0 %v17_v3 }
   0x7   :  { %155 = vmatpush3.msra.mxu0 %v17_v3 }
   0x8   :  { %156 = vmatprep.subr.mxu0 %v16_v4 }
   0x9   :  { %157 = vmatpush3.msra.mxu0 %v16_v4 }
   0xa   :  { %159 = vmatmul.mubr.msk.f32.vlgmr.msra.gmra.mxu0 %vm20_vm0, %v15_v5 }
  0xca   :  { %v160_v6 = vpop.f32.mrf.mxu0 }
  0xcb   :  { %108 = vst.msk [vmem:[#allocation2 + $0x8] sm:$0xff] %vm106_vm1, %v160_v6 }
  0xcc   :  { %v93_v7 = vpop.f32.mrf.mxu0 }
  0xcd   :  { %107 = vst.msk [vmem:[#allocation2] sm:$0xff] %vm106_vm1, %v93_v7 }
  0xd2   :  { %v124_v9 = vld [vmem:[#allocation2 + $0x8] sm:$0xff] }
  0xd3   :  { %v133_v10 = vadd.f32 %v143_v8, %v124_v9 }
  0xd4   :  { %v123_v11 = vld [vmem:[#allocation2] sm:$0xff] }
  0xd5   :  { %136 = vst.msk [vmem:[%s213_s3 + $0x8] sm:$0xff] %vm106_vm1, %v133_v10  ;;  %v132_v12 = vadd.f32 %v143_v8, %v123_v11 }
  0xd7   :  { %135 = vst.msk [vmem:[%s213_s3] sm:$0xff] %vm106_vm1, %v132_v12 }

// kernel: transformer_forward.36
= control target key start
LH: loop header
LB: loop body
LE: loop exit
PB: predicated region body
PF: predicated region fallthrough
CT: control target
= control target key end

     0   :  { %vm20_vm0 = vcmask 261120   ;;  %s211_s1 = inlined_call_operand.vmem [shape: f32[32,32], index: 1, kind: input, shape index: {}]   ;;  %s212_s0 = inlined_call_operand.vmem [shape: f32[16,32], index: 0, kind: input, shape index: {}]   ;;  %s213_s2 = inlined_call_operand.vmem [shape: f32[1,32], index: 2, kind: input, shape index: {}]   ;;  %s214_s3 = inlined_call_operand.vmem [shape: f32[16,32], index: 3, kind: output, shape index: {}]  }
   0x1   :  { %v19_v0 = vld [vmem:[%s211_s1 + $0x18] sm:$0xff]  ;;  %v18_v1 = vld [vmem:[%s211_s1 + $0x10] sm:$0xff]  ;;  %v14_v2 = vld [vmem:[%s212_s0] sm:$0xff] }
   0x2   :  { %147 = vmatprep.subr.mxu0 %v19_v0  ;;  %v17_v3 = vld [vmem:[%s211_s1 + $0x8] sm:$0xff]  ;;  %155 = vmatprep.mubr.msk.f32.mxu0 %vm20_vm0, %v14_v2  ;;  %v16_v4 = vld [vmem:[%s211_s1] sm:$0xff] }
   0x3   :  { %148 = vmatpush3.msra.mxu0 %v19_v0  ;;  %v15_v5 = vld [vmem:[%s212_s0 + $0x8] sm:$0xff]  ;;  %v140_v8 = vld [vmem:[%s213_s2] ss:$0 sm:$0xff] }
   0x4   :  { %149 = vmatprep.subr.mxu0 %v18_v1 }
   0x5   :  { %150 = vmatpush3.msra.mxu0 %v18_v1 }
   0x6   :  { %151 = vmatprep.subr.mxu0 %v17_v3 }
   0x7   :  { %152 = vmatpush3.msra.mxu0 %v17_v3 }
   0x8   :  { %153 = vmatprep.subr.mxu0 %v16_v4 }
   0x9   :  { %154 = vmatpush3.msra.mxu0 %v16_v4 }
   0xa   :  { %156 = vmatmul.mubr.msk.f32.vlgmr.msra.gmra.mxu0 %vm20_vm0, %v15_v5 }
  0xca   :  { %v157_v6 = vpop.f32.mrf.mxu0 }
  0xcb   :  { %107 = vst.msk [vmem:[#allocation2 + $0x8] sm:$0xff] %vm20_vm0, %v157_v6 }
  0xcc   :  { %v93_v7 = vpop.f32.mrf.mxu0 }
  0xcd   :  { %106 = vst.msk [vmem:[#allocation2] sm:$0xff] %vm20_vm0, %v93_v7 }
  0xd2   :  { %v122_v9 = vld [vmem:[#allocation2 + $0x8] sm:$0xff] }
  0xd3   :  { %v131_v10 = vadd.f32 %v140_v8, %v122_v9 }
  0xd4   :  { %v121_v11 = vld [vmem:[#allocation2] sm:$0xff] }
  0xd5   :  { %133 = vst.msk [vmem:[%s214_s3 + $0x8] sm:$0xff] %vm20_vm0, %v131_v10  ;;  %v130_v12 = vadd.f32 %v140_v8, %v121_v11 }
  0xd7   :  { %132 = vst.msk [vmem:[%s214_s3] sm:$0xff] %vm20_vm0, %v130_v12 }

// kernel: transformer_forward.38
= control target key start
LH: loop header
LB: loop body
LE: loop exit
PB: predicated region body
PF: predicated region fallthrough
CT: control target
= control target key end

     0   :  { %s1051_s9 = smov 0   ;;  %s1134_s0 = inlined_call_operand.vmem [shape: f32[2,8,32], index: 0, kind: input, shape index: {}]   ;;  %s1135_s1 = inlined_call_operand.vmem [shape: f32[2,8,64], index: 1, kind: input, shape index: {}]   ;;  %s1136_s2 = inlined_call_operand.vmem [shape: f32[2,8,32], index: 2, kind: output, shape index: {}]  }
   0x1 LB: > { %s902_s10 = sadd.s32 4294967295, %s1022_s9   ;;  %p906_p0 = scmp.ge.s32.totalorder %s1022_s9, 1  ;;  %s1022_s9 = sphi %s1051_s9, %s12_s9  }
   0x2   : > { %p120_p1 = scmp.lt.s32.totalorder %s1022_s9, 3 }
   0x4   : > { %p121_p2 = pnand %p906_p0, %p120_p1 }
   0x5   : > { %p144_p3 = scmp.lt.s32.totalorder (!%p121_p2), %s902_s10, 1  ;;  %s1026_s18 = smov (!%p121_p2), 96  }
   0x6   : > { %124 = sbr.rel (%p121_p2) target bundleno = 1350 (0x546), region = 28  ;;  %s1027_s19 = smov (!%p121_p2), 120  }
   0x7   : > { %s1028_s20 = smov (!%p121_p2), 112   ;;  %s1029_s21 = smov (!%p121_p2), 104  }
   0x8   : > { %s1030_s22 = smov (!%p121_p2), 88   ;;  %s1031_s23 = smov (!%p121_p2), 72  }
   0x9   : > { %s1032_s24 = smov (!%p121_p2), 80   ;;  %s1033_s25 = smov (!%p121_p2), 8  }
   0xa   : > { %s1034_s26 = smov (!%p121_p2), 16   ;;  %s1035_s27 = smov (!%p121_p2), 24  }
   0xb   : > { %v1024_v0 = vmov 0.0   ;;  %vm1025_vm0 = vmmov 0   ;;  %s1138_s10 = smov (!%p144_p3, %s902_s10), 1  ;;  %vm159_vm1 = vcmask 64512   ;;  %vm831_vm2 = vcmask 130048  }
   0xc   : > { %940 = vmatprep.subr.mxu0 %v1024_v0  ;;  %942 = vmatprep.mubr.msk.f32.mxu0 %vm1025_vm0, %v1024_v0  ;;  %s1065_s11 = sshll.u32 %s1138_s10, 3  ;;  %vm833_vm3 = vcmask 195584   ;;  %vm835_vm4 = vcmask 261120  }
   0xd   : > { %945 = vmatprep.subr.mxu1 %v1024_v0  ;;  %947 = vmatprep.mubr.msk.f32.mxu1 %vm1025_vm0, %v1024_v0  ;;  %s151_s14 = scalar_lea.vmem %s1135_s1, %s1065_s11  ;;  %s147_s17 = scalar_lea.vmem %s1134_s0, %s1065_s11 }
   0xe   : > { %v1075_v1 = vld [vmem:[%s151_s14] sm:$0xff]  ;;  %s155_s30 = scalar_lea.vmem %s1136_s2, %s1065_s11 }
   0xf   : > { %v156_v2 = vld [vmem:[%s147_s17] sm:$0xff]  ;;  %941 = vmatpush3.xpose.msk.msra.mxu0 %vm159_vm1, %v1075_v1  ;;  %247 = vrot.lane.b32.xlu1 %v1075_v1, %s1026_s18 }
  0x10   : > { %v157_v3 = vmul.f32 0.35355338, %v156_v2  ;;  %955 = vmatprep.subr.mxu0 %v1024_v0 }
  0x12   : > { %943 = vmatmul.mubr.msk.f32.vlgmr.msra.gmra.mxu0 %vm159_vm1, %v157_v3 }
  0x13   : > { %957 = vmatprep.mubr.msk.f32.mxu0 %vm1025_vm0, %v1024_v0  ;;  %325 = vrot.lane.b32.xlu1 %v1075_v1, %s1027_s19 }
  0x17   : > { %490 = vrot.lane.b32.xlu1 %v1075_v1, %s1028_s20 }
  0x1b   : > { %488 = vrot.lane.b32.xlu1 %v157_v3, %s1028_s20 }
  0x1f   : > { %655 = vrot.lane.b32.xlu1 %v1075_v1, %s1029_s21 }
  0x23   : > { %653 = vrot.lane.b32.xlu1 %v157_v3, %s1029_s21 }
  0x81   : > { %v248_v12 = vpop.permute.xlu1 %247 }
  0x82   : > { %946 = vmatpush3.msra.mxu1 %v248_v12 }
  0x83   : > { %950 = vmatprep.subr.mxu1 %v1024_v0 }
  0x85   : > { %v326_v14 = vpop.permute.xlu1 %325 }
  0x89   : > { %v491_v15 = vpop.permute.xlu1 %490 }
  0x8d   : > { %v489_v17 = vpop.permute.xlu1 %488 }
  0x91   : > { %v656_v20 = vpop.permute.xlu1 %655 }
  0x95   : > { %v654_v21 = vpop.permute.xlu1 %653 }
  0xd2   : > { %v232_v4 = vpop.f32.mrf.mxu0 }
  0xd3   : > { %v236_v5 = vsel %vm159_vm1, %v232_v4, -inf }
  0xd4   : > { %237 = vmax.xlane.f32.xlu0 %v236_v5  ;;  %v944_v6 = vpop.f32.mrf.mxu0 }
 0x15d   : > { %v238_v7 = vpop.xlane.xlu0 %237 }
 0x15e   : > { %v239_v8 = vsub.f32 %v232_v4, %v238_v7 }
 0x160   : > { %v240_v9 = vmul.f32 1.442695, %v239_v8 }
 0x162   : > { %1000 = vpow2.f32 %v240_v9 }
 0x16f   : > { %v1001_v10 = vpop.eup %1000 }
 0x170   : > { %v242_v11 = vsel %vm159_vm1, %v1001_v10, 0.0 }
 0x171   : > { %243 = vadd.xlane.f32.xlu0 %v242_v11 }
 0x187   : > { %323 = vrot.lane.b32.xlu0 %v157_v3, %s1027_s19 }
 0x1fa   : > { %v244_v13 = vpop.xlane.xlu0 %243 }
 0x1fb   : > { %1002 = vrcp.f32 %v244_v13 }
 0x1fe   : > { %v324_v19 = vpop.permute.xlu0 %323 }
 0x208   : > { %v1003_v16 = vpop.eup %1002 }
 0x209   : > { %v246_v18 = vmul.f32 %v1003_v16, %v1001_v10 }
 0x20b   : > { %948 = vmatmul.mubr.msk.f32.vlgmr.msra.gmra.mxu1 %vm159_vm1, %v246_v18 }
 0x20c   : > { %951 = vmatpush3.xpose.msk.msra.mxu1 %vm159_vm1, %v326_v14  ;;  %952 = vmatprep.mubr.msk.f32.mxu1 %vm1025_vm0, %v1024_v0 }
 0x20d   : > { %960 = vmatprep.subr.mxu1 %v1024_v0 }
 0x20f   : > { %953 = vmatmul.mubr.msk.f32.vlgmr.msra.gmra.mxu1 %vm159_vm1, %v324_v19 }
 0x210   : > { %961 = vmatpush3.xpose.msk.msra.mxu1 %vm159_vm1, %v491_v15  ;;  %962 = vmatprep.mubr.msk.f32.mxu1 %vm1025_vm0, %v1024_v0 }
 0x211   : > { %970 = vmatprep.subr.mxu1 %v1024_v0 }
 0x213   : > { %963 = vmatmul.mubr.msk.f32.vlgmr.msra.gmra.mxu1 %vm159_vm1, %v489_v17 }
 0x214   : > { %971 = vmatpush3.xpose.msk.msra.mxu1 %vm159_vm1, %v656_v20  ;;  %972 = vmatprep.mubr.msk.f32.mxu1 %vm1025_vm0, %v1024_v0 }
 0x217   : > { %973 = vmatmul.mubr.msk.f32.vlgmr.msra.gmra.mxu1 %vm159_vm1, %v654_v21 }
 0x2cb   : > { %v1105_v22 = vpop.f32.mrf.mxu1 }
 0x2cd   : > { %v949_v23 = vpop.f32.mrf.mxu1 }
 0x2cf   : > { %v397_v24 = vpop.f32.mrf.mxu1 }
 0x2d0   : > { %v401_v25 = vsel %vm159_vm1, %v397_v24, -inf }
 0x2d1   : > { %402 = vmax.xlane.f32.xlu1 %v401_v25  ;;  %v954_v26 = vpop.f32.mrf.mxu1 }
 0x2d3   : > { %v562_v27 = vpop.f32.mrf.mxu1 }
 0x2d4   : > { %v566_v28 = vsel %vm159_vm1, %v562_v27, -inf }
 0x2d5   : > { %567 = vmax.xlane.f32.xlu0 %v566_v28  ;;  %v964_v29 = vpop.f32.mrf.mxu1 }
 0x2d7   : > { %v727_v30 = vpop.f32.mrf.mxu1 }
 0x2d8   : > { %v731_v31 = vsel %vm159_vm1, %v727_v30, -inf }
 0x2d9   : > { %732 = vmax.xlane.f32.xlu1 %v731_v31  ;;  %v974_v32 = vpop.f32.mrf.mxu1 }
 0x2ea   : > { %412 = vrot.lane.b32.xlu1 %v1075_v1, %s1030_s22 }
 0x35a   : > { %v403_v33 = vpop.xlane.xlu1 %402 }
 0x35b   : > { %v404_v34 = vsub.f32 %v397_v24, %v403_v33 }
 0x35d   : > { %v405_v35 = vmul.f32 1.442695, %v404_v34 }
 0x35e   : > { %v568_v36 = vpop.xlane.xlu0 %567 }
 0x35f   : > { %1004 = vpow2.f32 %v405_v35  ;;  %v569_v37 = vsub.f32 %v562_v27, %v568_v36 }
 0x361   : > { %v570_v38 = vmul.f32 1.442695, %v569_v37 }
 0x362   : > { %v733_v39 = vpop.xlane.xlu1 %732 }
 0x363   : > { %1006 = vpow2.f32 %v570_v38  ;;  %v734_v40 = vsub.f32 %v727_v30, %v733_v39 }
 0x365   : > { %v735_v41 = vmul.f32 1.442695, %v734_v40 }
 0x366   : > { %v413_v42 = vpop.permute.xlu1 %412 }
 0x367   : > { %1008 = vpow2.f32 %v735_v41  ;;  %956 = vmatpush3.msra.mxu0 %v413_v42 }
 0x368   : > { %965 = vmatprep.subr.mxu0 %v1024_v0 }
 0x36c   : > { %v1005_v43 = vpop.eup %1004 }
 0x36d   : > { %v407_v44 = vsel %vm159_vm1, %v1005_v43, 0.0 }
 0x36e   : > { %408 = vadd.xlane.f32.xlu0 %v407_v44 }
 0x370   : > { %v1007_v45 = vpop.eup %1006 }
 0x371   : > { %v572_v46 = vsel %vm159_vm1, %v1007_v45, 0.0 }
 0x372   : > { %573 = vadd.xlane.f32.xlu1 %v572_v46 }
 0x374   : > { %v1009_v47 = vpop.eup %1008 }
 0x375   : > { %v737_v48 = vsel %vm159_vm1, %v1009_v47, 0.0 }
 0x376   : > { %738 = vadd.xlane.f32.xlu0 %v737_v48 }
 0x383   : > { %742 = vrot.lane.b32.xlu1 %v1075_v1, %s1031_s23 }
 0x38c   : > { %577 = vrot.lane.b32.xlu0 %v1075_v1, %s1032_s24 }
 0x3f7   : > { %v409_v49 = vpop.xlane.xlu0 %408 }
 0x3f8   : > { %1010 = vrcp.f32 %v409_v49 }
 0x3fb   : > { %v574_v50 = vpop.xlane.xlu1 %573 }
 0x3fc   : > { %1012 = vrcp.f32 %v574_v50 }
 0x3ff   : > { %v739_v51 = vpop.xlane.xlu0 %738  ;;  %v743_v56 = vpop.permute.xlu1 %742 }
 0x400   : > { %1014 = vrcp.f32 %v739_v51 }
 0x403   : > { %v578_v53 = vpop.permute.xlu0 %577 }
 0x405   : > { %v1011_v52 = vpop.eup %1010 }
 0x406   : > { %v411_v54 = vmul.f32 %v1011_v52, %v1005_v43 }
 0x408   : > { %958 = vmatmul.mubr.msk.f32.vlgmr.msra.gmra.mxu0 %vm159_vm1, %v411_v54 }
 0x409   : > { %v1013_v55 = vpop.eup %1012  ;;  %966 = vmatpush3.msra.mxu0 %v578_v53  ;;  %967 = vmatprep.mubr.msk.f32.mxu0 %vm1025_vm0, %v1024_v0 }
 0x40a   : > { %975 = vmatprep.subr.mxu0 %v1024_v0  ;;  %v576_v57 = vmul.f32 %v1013_v55, %v1007_v45 }
 0x40c   : > { %968 = vmatmul.mubr.msk.f32.vlgmr.msra.gmra.mxu0 %vm159_vm1, %v576_v57 }
 0x40d   : > { %v1015_v58 = vpop.eup %1014  ;;  %976 = vmatpush3.msra.mxu0 %v743_v56  ;;  %977 = vmatprep.mubr.msk.f32.mxu0 %vm1025_vm0, %v1024_v0 }
 0x40e   : > { %v741_v59 = vmul.f32 %v1015_v58, %v1009_v47 }
 0x410   : > { %978 = vmatmul.mubr.msk.f32.vlgmr.msra.gmra.mxu0 %vm159_vm1, %v741_v59 }
 0x4c8   : > { %v484_v60 = vpop.f32.mrf.mxu0 }
 0x4c9   : > { %819 = vrot.lane.b32.xlu1 %v484_v60, %s1033_s25 }
 0x4ca   : > { %v959_v61 = vpop.f32.mrf.mxu0 }
 0x4cc   : > { %v649_v62 = vpop.f32.mrf.mxu0 }
 0x4cd   : > { %823 = vrot.lane.b32.xlu0 %v649_v62, %s1034_s26 }
 0x4ce   : > { %v969_v63 = vpop.f32.mrf.mxu0 }
 0x4d0   : > { %v814_v1 = vpop.f32.mrf.mxu0 }
 0x4d1   : > { %827 = vrot.lane.b32.xlu1 %v814_v1, %s1035_s27 }
 0x4d2   : > { %v979_v2 = vpop.f32.mrf.mxu0 }
 0x53b   : > { %v820_v3 = vpop.permute.xlu1 %819 }
 0x53c   : > { %v830_v0 = vsel %vm159_vm1, %v1105_v22, %v820_v3 }
 0x53f   : > { %v824_v4 = vpop.permute.xlu0 %823 }
 0x540   : > { %v832_v5 = vsel %vm831_vm2, %v830_v0, %v824_v4 }
 0x543   : > { %v828_v6 = vpop.permute.xlu1 %827 }
 0x544   : > { %v834_v7 = vsel %vm833_vm3, %v832_v5, %v828_v6 }
 0x545   : > { %836 = vst.msk [vmem:[%s155_s30] sm:$0xff] %vm835_vm4, %v834_v7 }
 0x546 PF: > { %s12_s9 = sadd.s32 1, %s1022_s9  }
 0x547   : > { %p9_p4 = scmp.ge.s32.totalorder %s12_s9, 4  }
 0x549   :  { %11 = sbr.rel (!%p9_p4) target bundleno = 1 (0x1), region = 61 }

// kernel: transformer_forward.49
= control target key start
LH: loop header
LB: loop body
LE: loop exit
PB: predicated region body
PF: predicated region fallthrough
CT: control target
= control target key end

     0   :  { %vm21_vm0 = vcmask 261120   ;;  %s249_s0 = inlined_call_operand.vmem [shape: f32[16,32], index: 0, kind: input, shape index: {}]   ;;  %s250_s1 = inlined_call_operand.vmem [shape: f32[32,32], index: 1, kind: input, shape index: {}]   ;;  %s251_s2 = inlined_call_operand.vmem [shape: f32[1,32], index: 2, kind: input, shape index: {}]   ;;  %s252_s3 = inlined_call_operand.hbm [shape: f32[16,32], index: 3, kind: output, shape index: {}]  }
   0x1   :  { %v20_v0 = vld [vmem:[%s250_s1 + $0x18] sm:$0xff]  ;;  %v19_v1 = vld [vmem:[%s250_s1 + $0x10] sm:$0xff]  ;;  %v15_v2 = vld [vmem:[%s249_s0] sm:$0xff] }
   0x2   :  { %160 = vmatprep.subr.mxu0 %v20_v0  ;;  %v18_v3 = vld [vmem:[%s250_s1 + $0x8] sm:$0xff]  ;;  %168 = vmatprep.mubr.msk.f32.mxu0 %vm21_vm0, %v15_v2 }
   0x3   :  { %161 = vmatpush3.msra.mxu0 %v20_v0 }
   0x4   :  { %8 = vsyncpa [#allocation4], 0  ;;  %162 = vmatprep.subr.mxu0 %v19_v1  ;;  %v17_v4 = vld [vmem:[%s250_s1] sm:$0xff]  ;;  %v16_v5 = vld [vmem:[%s249_s0 + $0x8] sm:$0xff]  ;;  %s196_s1 = smov [#allocation3]  }
   0x5   :  { %163 = vmatpush3.msra.mxu0 %v19_v1  ;;  %v153_v8 = vld [vmem:[%s251_s2] ss:$0 sm:$0xff]  ;;  %s140_s26 = sshll.u32 %s196_s1, 4  ;;  %s141_s26 = int_to_ptr.vmem [resolvable:$true] %s140_s26 }
   0x6   :  { %164 = vmatprep.subr.mxu0 %v18_v3  ;;  %s174_s0 = scalar_lea.vmem %s141_s26, 256  ;;  %p179_p1 = scmp.lt.s32.totalorder %s141_s26, %s141_s26 }
   0x7   :  { %165 = vmatpush3.msra.mxu0 %v18_v3  ;;  %p175_p0 = scmp.ne.s32.totalorder %s141_s26, %s174_s0  ;;  %p180_p2 = scmp.lt.s32.totalorder %s174_s0, %s174_s0 }
   0x8   :  { %166 = vmatprep.subr.mxu0 %v17_v4 }
   0x9   :  { %167 = vmatpush3.msra.mxu0 %v17_v4  ;;  %p181_p3 = por %p180_p2, %p179_p1 }
   0xa   :  { %169 = vmatmul.mubr.msk.f32.vlgmr.msra.gmra.mxu0 %vm21_vm0, %v16_v5 }
   0xb   :  { %p182_p4 = pnand %p181_p3, %p175_p0 }
  0xca   :  { %v170_v6 = vpop.f32.mrf.mxu0 }
  0xcb   :  { %108 = vst.msk [vmem:[#allocation2 + $0x8] sm:$0xff] %vm21_vm0, %v170_v6 }
  0xcc   :  { %v94_v7 = vpop.f32.mrf.mxu0 }
  0xcd   :  { %107 = vst.msk [vmem:[#allocation2] sm:$0xff] %vm21_vm0, %v94_v7 }
  0xd2   :  { %v123_v9 = vld [vmem:[#allocation2 + $0x8] sm:$0xff] }
  0xd3   :  { %v132_v10 = vadd.f32 %v153_v8, %v123_v9 }
  0xd4   :  { %v122_v11 = vld [vmem:[#allocation2] sm:$0xff] }
  0xd5   :  { %v131_v12 = vadd.f32 %v153_v8, %v122_v11  ;;  %134 = vst.msk [vmem:[#allocation3 + $0x8] sm:$0xff] %vm21_vm0, %v132_v10 }
  0xd7   :  { %133 = vst.msk [vmem:[#allocation3] sm:$0xff] %vm21_vm0, %v131_v12 }
  0xd8   :  { %185 = shalt.err (!%p182_p4)
}
  0xd9   :  { %s197_s27 = smov 128   ;;  %s198_s2 = smov 8  }
  0xda   :  { %146 = dma.vmem_to_hbm [thread:$0]  %s141_s26, 256, %s252_s3, [#allocation4], %s197_s27, %s197_s27, %s198_s2  }
  0xdb   :  { %194 = dma.done.wait [#allocation4], 256  }
  0xdc   :  { %195 = vsyncadd [#allocation4], 4294967040 }
  0xdd   :  { %150 = vsyncpa [#allocation4], 1 }

</bundles_post_ra>
